<compile_context>
chip_gen: v6e
topology: v6e:2x2x1
jax: 0.10.0
libtpu: 0.0.40
codegen_flags: <defaults>
</compile_context>

<pallas_src>
import jax
import jax.numpy as jnp
from jax.experimental import pallas as pl
from jax.experimental.pallas import tpu as pltpu

INPUT_DIM = 32
OUTPUT_DIM = 32
NUM_HEADS = 16                        # self-attention heads   -> head_dim = 2
CROSS_HEADS = NUM_HEADS // 2          # cross-attention heads  -> head_dim = 4
HEAD_DIM_SA = INPUT_DIM // NUM_HEADS
HEAD_DIM_CA = OUTPUT_DIM // CROSS_HEADS
NUM_PERSPECTIVES = 3
NUM_GEO = 8
LN_EPS = 1e-5

# packed-parameter slab layout --------------------------------------------
WA_LANES = 128          # every weight chunk zero-padded to 128 lanes
NUM_WA_CHUNKS = 10      # slab A: (10, 32, 128) weight matrices
NUM_VB_ROWS = 48        # slab B: (48, 32) biases / LN / geo / head maps

# slab-B row indices
ROW_B1, ROW_B2, ROW_B3 = 0, 1, 2
ROW_SA_BQ, ROW_SA_BK, ROW_SA_BV, ROW_SA_BO = 3, 4, 5, 6
ROW_LN_G, ROW_LN_B = 7, 8
ROW_BP = 9
ROW_CA_BQ, ROW_CA_BK, ROW_CA_BV, ROW_CA_BO = 10, 11, 12, 13
ROW_BR = 14
ROW_GEO = 16            # 8 rows
ROW_RSA_T = 24          # 16 rows : (H_sa, E) head-expansion matrix
ROW_RCA_T = 40          # 8 rows  : (H_ca, E) head-expansion matrix


# ----------------------------- in-kernel math ------------------------------

def _gelu(x):
    # TODO(synk): PyTorch nn.GELU() default is the exact erf form; Mosaic has no
    # guaranteed erf lowering, so we use the tanh approximation.
    c = 0.7978845608028654  # sqrt(2/pi)
    return 0.5 * x * (1.0 + jnp.tanh(c * (x + 0.044715 * x * x * x)))


def _silu(x):
    # numerically stable sigmoid (no exp(+large)); reciprocal on the EUP
    z = jnp.exp(-jnp.abs(x))
    sig = jnp.where(x >= 0, 1.0, z) * pl.reciprocal(1.0 + z, approx=True)
    return x * sig


def _layernorm(x, g, b):
    mu = jnp.mean(x, axis=-1, keepdims=True)
    xc = x - mu
    var = jnp.mean(xc * xc, axis=-1, keepdims=True)
    return xc * jax.lax.rsqrt(var + LN_EPS) * g + b


# --------------------------------- kernel ----------------------------------

def feature_perspective_kernel(x_ref, wa_ref, vb_ref, out_ref):
    f32 = jnp.float32
    D = INPUT_DIM
    Do = OUTPUT_DIM
    tb = x_ref.shape[0]                 # batch rows in this block (static)

    def row(i):                         # (1, 32) bias / vector row
        return vb_ref[i:i + 1, :]

    x = x_ref[...].astype(f32)                                   # (TB, D)

    # --- three activation "perspectives": ONE fused (TB,D)@(D,3D) matmul ---
    w123 = wa_ref[0, :, 0:3 * D]                                 # (D, 3D)
    y = jnp.dot(x, w123, preferred_element_type=f32)             # (TB, 3D)
    f1 = _gelu(y[:, 0:D] + row(ROW_B1))
    f2 = _silu(y[:, D:2 * D] + row(ROW_B2))
    f3 = jnp.tanh(y[:, 2 * D:3 * D] + row(ROW_B3))
    # token-major 3-token sequence: row index = t*TB + b   (dropout = identity)
    feat = jnp.concatenate([f1, f2, f3], axis=0)                 # (3TB, D)

    # --- self-attention over the 3 perspective tokens (H=16, hd=2) ---------
    wqkv = wa_ref[1, :, 0:3 * D]                                 # (D, 3D) fused QKV
    qkv = jnp.dot(feat, wqkv, preferred_element_type=f32)        # (3TB, 3D)
    scale_sa = 1.0 / float(HEAD_DIM_SA) ** 0.5
    q = (qkv[:, 0:D] + row(ROW_SA_BQ)) * scale_sa
    k = qkv[:, D:2 * D] + row(ROW_SA_BK)
    v = qkv[:, 2 * D:3 * D] + row(ROW_SA_BV)

    r_sa = wa_ref[8, :, 0:NUM_HEADS]                             # (D, H) head-sum map
    r_sa_t = vb_ref[ROW_RSA_T:ROW_RSA_T + NUM_HEADS, :]          # (H, D) head-expand map

    # per-key scores for ALL (batch, query-token, head) at once: (3TB, H)
    scores = []
    for t in range(NUM_PERSPECTIVES):
        k_tok = k[t * tb:(t + 1) * tb, :]                        # (TB, D)
        k_rep = jnp.concatenate([k_tok] * NUM_PERSPECTIVES, axis=0)   # (3TB, D)
        scores.append(jnp.dot(q * k_rep, r_sa, preferred_element_type=f32))
    m = jnp.maximum(jnp.maximum(scores[0], scores[1]), scores[2])
    ex = [jnp.exp(s - m) for s in scores]
    inv = pl.reciprocal(ex[0] + ex[1] + ex[2], approx=True)
    attn = None
    for t in range(NUM_PERSPECTIVES):
        v_tok = v[t * tb:(t + 1) * tb, :]
        v_rep = jnp.concatenate([v_tok] * NUM_PERSPECTIVES, axis=0)
        p_full = jnp.dot(ex[t] * inv, r_sa_t, preferred_element_type=f32)  # (3TB, D)
        contrib = p_full * v_rep
        attn = contrib if attn is None else attn + contrib
    sa_wo = wa_ref[2, :, 0:D]
    attn = jnp.dot(attn, sa_wo, preferred_element_type=f32) + row(ROW_SA_BO)
    attn = _layernorm(attn, row(ROW_LN_G), row(ROW_LN_B))

    # --- project to output_dim ---------------------------------------------
    wp = wa_ref[3, :, 0:Do]
    proj = jnp.dot(attn, wp, preferred_element_type=f32) + row(ROW_BP)     # (3TB, Do)

    # --- cross-attention against the geo queries (H=8, hd=4) ----------------
    # TODO(synk): reference passes `features` as the MHA value with a key of a
    # different sequence length (invalid in PyTorch); we use key=value=geo_queries.
    geo = vb_ref[ROW_GEO:ROW_GEO + NUM_GEO, :]                   # (8, Do)
    ca_wkv = wa_ref[5, :, 0:2 * Do]                              # (Do, 2Do) fused K|V
    kv_g = jnp.dot(geo, ca_wkv, preferred_element_type=f32)      # (8, 2Do)
    kg = kv_g[:, 0:Do] + row(ROW_CA_BK)                          # (8, Do)
    vg = kv_g[:, Do:2 * Do] + row(ROW_CA_BV)                     # (8, Do)

    ca_wq = wa_ref[4, :, 0:Do]
    scale_ca = 1.0 / float(HEAD_DIM_CA) ** 0.5
    qc = (jnp.dot(proj, ca_wq, preferred_element_type=f32)
          + row(ROW_CA_BQ)) * scale_ca                           # (3TB, Do)

    r_ca = wa_ref[9, :, 0:CROSS_HEADS]                           # (Do, Hc)
    r_ca_t = vb_ref[ROW_RCA_T:ROW_RCA_T + CROSS_HEADS, :]        # (Hc, Do)

    cs = [jnp.dot(qc * kg[g:g + 1, :], r_ca, preferred_element_type=f32)
          for g in range(NUM_GEO)]                               # each (3TB, Hc)
    m = cs[0]
    for g in range(1, NUM_GEO):
        m = jnp.maximum(m, cs[g])
    ex = [jnp.exp(s - m) for s in cs]
    den = ex[0]
    for g in range(1, NUM_GEO):
        den = den + ex[g]
    inv = pl.reciprocal(den, approx=True)
    cross = None
    for g in range(NUM_GEO):
        p_full = jnp.dot(ex[g] * inv, r_ca_t, preferred_element_type=f32)  # (3TB, Do)
        contrib = p_full * vg[g:g + 1, :]
        cross = contrib if cross is None else cross + contrib
    ca_wo = wa_ref[6, :, 0:Do]
    cross = jnp.dot(cross, ca_wo, preferred_element_type=f32) + row(ROW_CA_BO)

    # --- refinement: Linear + GELU ------------------------------------------
    wr = wa_ref[7, :, 0:Do]
    refined = _gelu(jnp.dot(cross, wr, preferred_element_type=f32) + row(ROW_BR))

    # --- store (token-major rows -> (B, 3, Do)): 3 full-block stores ---------
    for t in range(NUM_PERSPECTIVES):
        out_ref[:, t, :] = refined[t * tb:(t + 1) * tb, :].astype(out_ref.dtype)


# ------------------------------ host wrapper -------------------------------

def feature_perspective(x, wa, vb, *, tile_b=8):
    bsz = x.shape[0]
    tb = min(bsz, tile_b)
    grid = (pl.cdiv(bsz, tb),)
    return pl.pallas_call(
        feature_perspective_kernel,
        out_shape=jax.ShapeDtypeStruct((bsz, NUM_PERSPECTIVES, OUTPUT_DIM),
                                       jnp.float32),
        grid=grid,
        in_specs=[
            pl.BlockSpec((tb, INPUT_DIM), lambda i: (i, 0)),
            pl.BlockSpec((NUM_WA_CHUNKS, INPUT_DIM, WA_LANES), lambda i: (0, 0, 0)),
            pl.BlockSpec((NUM_VB_ROWS, INPUT_DIM), lambda i: (0, 0)),
        ],
        out_specs=pl.BlockSpec((tb, NUM_PERSPECTIVES, OUTPUT_DIM),
                               lambda i: (i, 0, 0)),
        compiler_params=pltpu.CompilerParams(
            dimension_semantics=("parallel",)),
    )(x, wa, vb)


# -------------------------- parameter construction -------------------------

def init_params(key):
    """Logical parameters in standard PyTorch layouts."""
    din, dout = INPUT_DIM, OUTPUT_DIM
    ks = jax.random.split(key, 12)

    def kaiming(k, shape):  # kaiming_normal_, nonlinearity='relu', fan_in
        return jax.random.normal(k, shape, jnp.float32) * (2.0 / shape[1]) ** 0.5

    def xavier(k, shape):
        fan_out, fan_in = shape
        return jax.random.normal(k, shape, jnp.float32) * (2.0 / (fan_in + fan_out)) ** 0.5

    p = {}
    p["w1"] = kaiming(ks[0], (din, din))
    p["w2"] = kaiming(ks[1], (din, din))
    p["w3"] = kaiming(ks[2], (din, din))
    p["b1"] = jnp.zeros((din,), jnp.float32)
    p["b2"] = jnp.zeros((din,), jnp.float32)
    p["b3"] = jnp.zeros((din,), jnp.float32)

    p["sa_in_w"] = xavier(ks[3], (3 * din, din))       # packed Wq|Wk|Wv
    p["sa_in_b"] = jnp.zeros((3 * din,), jnp.float32)
    p["sa_out_w"] = xavier(ks[4], (din, din))
    p["sa_out_b"] = jnp.zeros((din,), jnp.float32)

    p["ln_g"] = jnp.ones((din,), jnp.float32)
    p["ln_b"] = jnp.zeros((din,), jnp.float32)

    p["wp"] = kaiming(ks[5], (dout, din))
    p["bp"] = 0.01 * jax.random.normal(ks[6], (dout,), jnp.float32)

    p["geo"] = 0.02 * jax.random.normal(ks[7], (NUM_GEO, dout), jnp.float32)

    p["ca_in_w"] = xavier(ks[8], (3 * dout, dout))
    p["ca_in_b"] = jnp.zeros((3 * dout,), jnp.float32)
    p["ca_out_w"] = xavier(ks[9], (dout, dout))
    p["ca_out_b"] = jnp.zeros((dout,), jnp.float32)

    p["wr"] = xavier(ks[10], (dout, dout))
    p["br"] = 0.01 * jax.random.normal(ks[11], (dout,), jnp.float32)
    return p


def pack_params(p):
    """Pack logical params into two lane-dense slabs (3 kernel inputs total)."""
    din, dout = INPUT_DIM, OUTPUT_DIM

    def head_map(dim, heads):
        hd = dim // heads
        lane = jnp.arange(dim)[:, None] // hd
        return (lane == jnp.arange(heads)[None, :]).astype(jnp.float32)  # (dim, heads)

    r_sa = head_map(din, NUM_HEADS)        # (32, 16)
    r_ca = head_map(dout, CROSS_HEADS)     # (32, 8)

    chunks = [
        jnp.concatenate([p["w1"].T, p["w2"].T, p["w3"].T], axis=1),  # 0: fused perspectives
        p["sa_in_w"].T,                                              # 1: fused self QKV
        p["sa_out_w"].T,                                             # 2
        p["wp"].T,                                                   # 3
        p["ca_in_w"][:dout].T,                                       # 4: cross Q
        p["ca_in_w"][dout:].T,                                       # 5: fused cross K|V
        p["ca_out_w"].T,                                             # 6
        p["wr"].T,                                                   # 7
        r_sa,                                                        # 8
        r_ca,                                                        # 9
    ]
    wa = jnp.stack(
        [jnp.pad(c, ((0, 0), (0, WA_LANES - c.shape[1]))) for c in chunks]
    ).astype(jnp.float32)                                            # (10, 32, 128)

    rows = [
        p["b1"], p["b2"], p["b3"],
        p["sa_in_b"][:din], p["sa_in_b"][din:2 * din], p["sa_in_b"][2 * din:],
        p["sa_out_b"], p["ln_g"], p["ln_b"], p["bp"],
        p["ca_in_b"][:dout], p["ca_in_b"][dout:2 * dout], p["ca_in_b"][2 * dout:],
        p["ca_out_b"], p["br"],
        jnp.zeros((din,), jnp.float32),                              # pad to 16 rows
    ]
    vb = jnp.concatenate(
        [jnp.stack(rows), p["geo"], r_sa.T, r_ca.T], axis=0
    ).astype(jnp.float32)                                            # (48, 32)
    return wa, vb


if __name__ == "__main__":
    key = jax.random.PRNGKey(0)
    kx, kp = jax.random.split(key)
    batch = 2
    x = jax.random.normal(kx, (batch, INPUT_DIM), jnp.float32)
    params = init_params(kp)
    wa, vb = pack_params(params)

    out = feature_perspective(x, wa, vb)
    out = jax.block_until_ready(out)
    assert out.shape == (batch, NUM_PERSPECTIVES, OUTPUT_DIM), out.shape
    assert bool(jnp.all(jnp.isfinite(out)))
    print("KERNEL_OK")
</pallas_src>

<mosaic_0001>
module attributes {stable_mosaic.version = 11 : i64} {
  func.func @feature_perspective_kernel(%arg0: i32, %arg1: memref<2x32xf32, #tpu.memory_space<vmem>>, %arg2: memref<10x32x128xf32, #tpu.memory_space<vmem>>, %arg3: memref<48x32xf32, #tpu.memory_space<vmem>>, %arg4: memref<2x3x32xf32, #tpu.memory_space<vmem>>) attributes {dimension_semantics = [#tpu.dimension_semantics<parallel>], iteration_bounds = array<i64: 1>, scalar_prefetch = 0 : i64, scratch_operands = 0 : i64, tpu.core_type = #tpu.core_type<tc>, window_params = [{transform_indices = @transform_0, window_bounds = array<i64: 2, 32>}, {pipeline_mode = #tpu.pipeline_mode<synchronous>, transform_indices = @transform_1, window_bounds = array<i64: 10, 32, 128>}, {pipeline_mode = #tpu.pipeline_mode<synchronous>, transform_indices = @transform_2, window_bounds = array<i64: 48, 32>}, {transform_indices = @transform_3, window_bounds = array<i64: 2, 3, 32>}]} {
    %c0 = arith.constant 0 : index
    %c0_0 = arith.constant 0 : index
    %0 = vector.load %arg1[%c0, %c0_0] : memref<2x32xf32, #tpu.memory_space<vmem>>, vector<2x32xf32>
    %c0_1 = arith.constant 0 : index
    %c0_2 = arith.constant 0 : index
    %c0_3 = arith.constant 0 : index
    %1 = vector.load %arg2[%c0_1, %c0_2, %c0_3] : memref<10x32x128xf32, #tpu.memory_space<vmem>>, vector<1x32x96xf32>
    %2 = vector.shape_cast %1 : vector<1x32x96xf32> to vector<32x96xf32>
    %cst = arith.constant dense<0.000000e+00> : vector<2x96xf32>
    %3 = tpu.matmul %0, %2, %cst {dimension_numbers = #tpu.dot_dimension_numbers<[1], [0], [0], [1], [0, 0, 1, 1], [], []>} : vector<2x32xf32>, vector<32x96xf32>, vector<2x96xf32> -> vector<2x96xf32>
    %4 = vector.extract_strided_slice %3 {offsets = [0, 0], sizes = [2, 32], strides = [1, 1]} : vector<2x96xf32> to vector<2x32xf32>
    %c0_4 = arith.constant 0 : index
    %c0_5 = arith.constant 0 : index
    %5 = vector.load %arg3[%c0_4, %c0_5] : memref<48x32xf32, #tpu.memory_space<vmem>>, vector<1x32xf32>
    %6 = vector.broadcast %5 : vector<1x32xf32> to vector<2x32xf32>
    %7 = arith.addf %4, %6 : vector<2x32xf32>
    %cst_6 = arith.constant 5.000000e-01 : f32
    %8 = vector.broadcast %cst_6 : f32 to vector<2x32xf32>
    %9 = arith.mulf %8, %7 : vector<2x32xf32>
    %cst_7 = arith.constant 4.471500e-02 : f32
    %10 = vector.broadcast %cst_7 : f32 to vector<2x32xf32>
    %11 = arith.mulf %10, %7 : vector<2x32xf32>
    %12 = arith.mulf %11, %7 : vector<2x32xf32>
    %13 = arith.mulf %12, %7 : vector<2x32xf32>
    %14 = arith.addf %7, %13 : vector<2x32xf32>
    %cst_8 = arith.constant 0.797884583 : f32
    %15 = vector.broadcast %cst_8 : f32 to vector<2x32xf32>
    %16 = arith.mulf %15, %14 : vector<2x32xf32>
    %17 = math.tanh %16 : vector<2x32xf32>
    %cst_9 = arith.constant 1.000000e+00 : f32
    %18 = vector.broadcast %cst_9 : f32 to vector<2x32xf32>
    %19 = arith.addf %18, %17 : vector<2x32xf32>
    %20 = arith.mulf %9, %19 : vector<2x32xf32>
    %21 = vector.extract_strided_slice %3 {offsets = [0, 32], sizes = [2, 32], strides = [1, 1]} : vector<2x96xf32> to vector<2x32xf32>
    %c1 = arith.constant 1 : index
    %c0_10 = arith.constant 0 : index
    %22 = vector.load %arg3[%c1, %c0_10] : memref<48x32xf32, #tpu.memory_space<vmem>>, vector<1x32xf32>
    %23 = vector.broadcast %22 : vector<1x32xf32> to vector<2x32xf32>
    %24 = arith.addf %21, %23 : vector<2x32xf32>
    %25 = math.absf %24 : vector<2x32xf32>
    %cst_11 = arith.constant 0.000000e+00 : f32
    %26 = vector.broadcast %cst_11 : f32 to vector<2x32xf32>
    %27 = arith.subf %26, %25 : vector<2x32xf32>
    %28 = math.exp %27 : vector<2x32xf32>
    %cst_12 = arith.constant 0.000000e+00 : f32
    %29 = vector.broadcast %cst_12 : f32 to vector<2x32xf32>
    %30 = arith.cmpf oge, %24, %29 : vector<2x32xf32>
    %cst_13 = arith.constant 1.000000e+00 : f32
    %31 = vector.broadcast %cst_13 : f32 to vector<2x32xf32>
    %32 = arith.select %30, %31, %28 : vector<2x32xi1>, vector<2x32xf32>
    %cst_14 = arith.constant 1.000000e+00 : f32
    %33 = vector.broadcast %cst_14 : f32 to vector<2x32xf32>
    %34 = arith.addf %33, %28 : vector<2x32xf32>
    %35 = tpu.reciprocal %34 {approx = true} : vector<2x32xf32> -> vector<2x32xf32>
    %36 = arith.mulf %32, %35 : vector<2x32xf32>
    %37 = arith.mulf %24, %36 : vector<2x32xf32>
    %38 = vector.extract_strided_slice %3 {offsets = [0, 64], sizes = [2, 32], strides = [1, 1]} : vector<2x96xf32> to vector<2x32xf32>
    %c2 = arith.constant 2 : index
    %c0_15 = arith.constant 0 : index
    %39 = vector.load %arg3[%c2, %c0_15] : memref<48x32xf32, #tpu.memory_space<vmem>>, vector<1x32xf32>
    %40 = vector.broadcast %39 : vector<1x32xf32> to vector<2x32xf32>
    %41 = arith.addf %38, %40 : vector<2x32xf32>
    %42 = math.tanh %41 : vector<2x32xf32>
    %43 = tpu.concatenate %20, %37, %42 in 0 : vector<2x32xf32>, vector<2x32xf32>, vector<2x32xf32> -> vector<6x32xf32>
    %c1_16 = arith.constant 1 : index
    %c0_17 = arith.constant 0 : index
    %c0_18 = arith.constant 0 : index
    %44 = vector.load %arg2[%c1_16, %c0_17, %c0_18] : memref<10x32x128xf32, #tpu.memory_space<vmem>>, vector<1x32x96xf32>
    %45 = vector.shape_cast %44 : vector<1x32x96xf32> to vector<32x96xf32>
    %cst_19 = arith.constant dense<0.000000e+00> : vector<6x96xf32>
    %46 = tpu.matmul %43, %45, %cst_19 {dimension_numbers = #tpu.dot_dimension_numbers<[1], [0], [0], [1], [0, 0, 1, 1], [], []>} : vector<6x32xf32>, vector<32x96xf32>, vector<6x96xf32> -> vector<6x96xf32>
    %47 = vector.extract_strided_slice %46 {offsets = [0, 0], sizes = [6, 32], strides = [1, 1]} : vector<6x96xf32> to vector<6x32xf32>
    %c3 = arith.constant 3 : index
    %c0_20 = arith.constant 0 : index
    %48 = vector.load %arg3[%c3, %c0_20] : memref<48x32xf32, #tpu.memory_space<vmem>>, vector<1x32xf32>
    %49 = vector.broadcast %48 : vector<1x32xf32> to vector<6x32xf32>
    %50 = arith.addf %47, %49 : vector<6x32xf32>
    %cst_21 = arith.constant 0.707106769 : f32
    %51 = vector.broadcast %cst_21 : f32 to vector<6x32xf32>
    %52 = arith.mulf %50, %51 : vector<6x32xf32>
    %53 = vector.extract_strided_slice %46 {offsets = [0, 32], sizes = [6, 32], strides = [1, 1]} : vector<6x96xf32> to vector<6x32xf32>
    %c4 = arith.constant 4 : index
    %c0_22 = arith.constant 0 : index
    %54 = vector.load %arg3[%c4, %c0_22] : memref<48x32xf32, #tpu.memory_space<vmem>>, vector<1x32xf32>
    %55 = vector.broadcast %54 : vector<1x32xf32> to vector<6x32xf32>
    %56 = arith.addf %53, %55 : vector<6x32xf32>
    %57 = vector.extract_strided_slice %46 {offsets = [0, 64], sizes = [6, 32], strides = [1, 1]} : vector<6x96xf32> to vector<6x32xf32>
    %c5 = arith.constant 5 : index
    %c0_23 = arith.constant 0 : index
    %58 = vector.load %arg3[%c5, %c0_23] : memref<48x32xf32, #tpu.memory_space<vmem>>, vector<1x32xf32>
    %59 = vector.broadcast %58 : vector<1x32xf32> to vector<6x32xf32>
    %60 = arith.addf %57, %59 : vector<6x32xf32>
    %c8 = arith.constant 8 : index
    %c0_24 = arith.constant 0 : index
    %c0_25 = arith.constant 0 : index
    %61 = vector.load %arg2[%c8, %c0_24, %c0_25] : memref<10x32x128xf32, #tpu.memory_space<vmem>>, vector<1x32x16xf32>
    %62 = vector.shape_cast %61 : vector<1x32x16xf32> to vector<32x16xf32>
    %c24 = arith.constant 24 : index
    %c0_26 = arith.constant 0 : index
    %63 = vector.load %arg3[%c24, %c0_26] : memref<48x32xf32, #tpu.memory_space<vmem>>, vector<16x32xf32>
    %64 = vector.extract_strided_slice %56 {offsets = [0, 0], sizes = [2, 32], strides = [1, 1]} : vector<6x32xf32> to vector<2x32xf32>
    %65 = tpu.concatenate %64, %64, %64 in 0 : vector<2x32xf32>, vector<2x32xf32>, vector<2x32xf32> -> vector<6x32xf32>
    %66 = arith.mulf %52, %65 : vector<6x32xf32>
    %cst_27 = arith.constant dense<0.000000e+00> : vector<6x16xf32>
    %67 = tpu.matmul %66, %62, %cst_27 {dimension_numbers = #tpu.dot_dimension_numbers<[1], [0], [0], [1], [0, 0, 1, 1], [], []>} : vector<6x32xf32>, vector<32x16xf32>, vector<6x16xf32> -> vector<6x16xf32>
    %68 = vector.extract_strided_slice %56 {offsets = [2, 0], sizes = [2, 32], strides = [1, 1]} : vector<6x32xf32> to vector<2x32xf32>
    %69 = tpu.concatenate %68, %68, %68 in 0 : vector<2x32xf32>, vector<2x32xf32>, vector<2x32xf32> -> vector<6x32xf32>
    %70 = arith.mulf %52, %69 : vector<6x32xf32>
    %cst_28 = arith.constant dense<0.000000e+00> : vector<6x16xf32>
    %71 = tpu.matmul %70, %62, %cst_28 {dimension_numbers = #tpu.dot_dimension_numbers<[1], [0], [0], [1], [0, 0, 1, 1], [], []>} : vector<6x32xf32>, vector<32x16xf32>, vector<6x16xf32> -> vector<6x16xf32>
    %72 = vector.extract_strided_slice %56 {offsets = [4, 0], sizes = [2, 32], strides = [1, 1]} : vector<6x32xf32> to vector<2x32xf32>
    %73 = tpu.concatenate %72, %72, %72 in 0 : vector<2x32xf32>, vector<2x32xf32>, vector<2x32xf32> -> vector<6x32xf32>
    %74 = arith.mulf %52, %73 : vector<6x32xf32>
    %cst_29 = arith.constant dense<0.000000e+00> : vector<6x16xf32>
    %75 = tpu.matmul %74, %62, %cst_29 {dimension_numbers = #tpu.dot_dimension_numbers<[1], [0], [0], [1], [0, 0, 1, 1], [], []>} : vector<6x32xf32>, vector<32x16xf32>, vector<6x16xf32> -> vector<6x16xf32>
    %76 = arith.maximumf %67, %71 : vector<6x16xf32>
    %77 = arith.maximumf %76, %75 : vector<6x16xf32>
    %78 = arith.subf %67, %77 : vector<6x16xf32>
    %79 = math.exp %78 : vector<6x16xf32>
    %80 = arith.subf %71, %77 : vector<6x16xf32>
    %81 = math.exp %80 : vector<6x16xf32>
    %82 = arith.subf %75, %77 : vector<6x16xf32>
    %83 = math.exp %82 : vector<6x16xf32>
    %84 = arith.addf %79, %81 : vector<6x16xf32>
    %85 = arith.addf %84, %83 : vector<6x16xf32>
    %86 = tpu.reciprocal %85 {approx = true} : vector<6x16xf32> -> vector<6x16xf32>
    %87 = vector.extract_strided_slice %60 {offsets = [0, 0], sizes = [2, 32], strides = [1, 1]} : vector<6x32xf32> to vector<2x32xf32>
    %88 = tpu.concatenate %87, %87, %87 in 0 : vector<2x32xf32>, vector<2x32xf32>, vector<2x32xf32> -> vector<6x32xf32>
    %89 = arith.mulf %79, %86 : vector<6x16xf32>
    %cst_30 = arith.constant dense<0.000000e+00> : vector<6x32xf32>
    %90 = tpu.matmul %89, %63, %cst_30 {dimension_numbers = #tpu.dot_dimension_numbers<[1], [0], [0], [1], [0, 0, 1, 1], [], []>} : vector<6x16xf32>, vector<16x32xf32>, vector<6x32xf32> -> vector<6x32xf32>
    %91 = arith.mulf %90, %88 : vector<6x32xf32>
    %92 = vector.extract_strided_slice %60 {offsets = [2, 0], sizes = [2, 32], strides = [1, 1]} : vector<6x32xf32> to vector<2x32xf32>
    %93 = tpu.concatenate %92, %92, %92 in 0 : vector<2x32xf32>, vector<2x32xf32>, vector<2x32xf32> -> vector<6x32xf32>
    %94 = arith.mulf %81, %86 : vector<6x16xf32>
    %cst_31 = arith.constant dense<0.000000e+00> : vector<6x32xf32>
    %95 = tpu.matmul %94, %63, %cst_31 {dimension_numbers = #tpu.dot_dimension_numbers<[1], [0], [0], [1], [0, 0, 1, 1], [], []>} : vector<6x16xf32>, vector<16x32xf32>, vector<6x32xf32> -> vector<6x32xf32>
    %96 = arith.mulf %95, %93 : vector<6x32xf32>
    %97 = arith.addf %91, %96 : vector<6x32xf32>
    %98 = vector.extract_strided_slice %60 {offsets = [4, 0], sizes = [2, 32], strides = [1, 1]} : vector<6x32xf32> to vector<2x32xf32>
    %99 = tpu.concatenate %98, %98, %98 in 0 : vector<2x32xf32>, vector<2x32xf32>, vector<2x32xf32> -> vector<6x32xf32>
    %100 = arith.mulf %83, %86 : vector<6x16xf32>
    %cst_32 = arith.constant dense<0.000000e+00> : vector<6x32xf32>
    %101 = tpu.matmul %100, %63, %cst_32 {dimension_numbers = #tpu.dot_dimension_numbers<[1], [0], [0], [1], [0, 0, 1, 1], [], []>} : vector<6x16xf32>, vector<16x32xf32>, vector<6x32xf32> -> vector<6x32xf32>
    %102 = arith.mulf %101, %99 : vector<6x32xf32>
    %103 = arith.addf %97, %102 : vector<6x32xf32>
    %c2_33 = arith.constant 2 : index
    %c0_34 = arith.constant 0 : index
    %c0_35 = arith.constant 0 : index
    %104 = vector.load %arg2[%c2_33, %c0_34, %c0_35] : memref<10x32x128xf32, #tpu.memory_space<vmem>>, vector<1x32x32xf32>
    %105 = vector.shape_cast %104 : vector<1x32x32xf32> to vector<32x32xf32>
    %cst_36 = arith.constant dense<0.000000e+00> : vector<6x32xf32>
    %106 = tpu.matmul %103, %105, %cst_36 {dimension_numbers = #tpu.dot_dimension_numbers<[1], [0], [0], [1], [0, 0, 1, 1], [], []>} : vector<6x32xf32>, vector<32x32xf32>, vector<6x32xf32> -> vector<6x32xf32>
    %c6 = arith.constant 6 : index
    %c0_37 = arith.constant 0 : index
    %107 = vector.load %arg3[%c6, %c0_37] : memref<48x32xf32, #tpu.memory_space<vmem>>, vector<1x32xf32>
    %108 = vector.broadcast %107 : vector<1x32xf32> to vector<6x32xf32>
    %109 = arith.addf %106, %108 : vector<6x32xf32>
    %c7 = arith.constant 7 : index
    %c0_38 = arith.constant 0 : index
    %110 = vector.load %arg3[%c7, %c0_38] : memref<48x32xf32, #tpu.memory_space<vmem>>, vector<1x32xf32>
    %c8_39 = arith.constant 8 : index
    %c0_40 = arith.constant 0 : index
    %111 = vector.load %arg3[%c8_39, %c0_40] : memref<48x32xf32, #tpu.memory_space<vmem>>, vector<1x32xf32>
    %cst_41 = arith.constant dense<0.000000e+00> : vector<6xf32>
    %112 = vector.multi_reduction <add>, %109, %cst_41 [1] : vector<6x32xf32> to vector<6xf32>
    %113 = vector.shape_cast %112 : vector<6xf32> to vector<6x1xf32>
    %cst_42 = arith.constant 3.200000e+01 : f32
    %114 = vector.broadcast %cst_42 : f32 to vector<6x1xf32>
    %115 = arith.divf %113, %114 : vector<6x1xf32>
    %116 = vector.broadcast %115 : vector<6x1xf32> to vector<6x32xf32>
    %117 = arith.subf %109, %116 : vector<6x32xf32>
    %118 = arith.mulf %117, %117 : vector<6x32xf32>
    %cst_43 = arith.constant dense<0.000000e+00> : vector<6xf32>
    %119 = vector.multi_reduction <add>, %118, %cst_43 [1] : vector<6x32xf32> to vector<6xf32>
    %120 = vector.shape_cast %119 : vector<6xf32> to vector<6x1xf32>
    %cst_44 = arith.constant 3.200000e+01 : f32
    %121 = vector.broadcast %cst_44 : f32 to vector<6x1xf32>
    %122 = arith.divf %120, %121 : vector<6x1xf32>
    %cst_45 = arith.constant 9.99999974E-6 : f32
    %123 = vector.broadcast %cst_45 : f32 to vector<6x1xf32>
    %124 = arith.addf %122, %123 : vector<6x1xf32>
    %125 = math.rsqrt %124 : vector<6x1xf32>
    %126 = vector.broadcast %125 : vector<6x1xf32> to vector<6x32xf32>
    %127 = arith.mulf %117, %126 : vector<6x32xf32>
    %128 = vector.broadcast %110 : vector<1x32xf32> to vector<6x32xf32>
    %129 = arith.mulf %127, %128 : vector<6x32xf32>
    %130 = vector.broadcast %111 : vector<1x32xf32> to vector<6x32xf32>
    %131 = arith.addf %129, %130 : vector<6x32xf32>
    %c3_46 = arith.constant 3 : index
    %c0_47 = arith.constant 0 : index
    %c0_48 = arith.constant 0 : index
    %132 = vector.load %arg2[%c3_46, %c0_47, %c0_48] : memref<10x32x128xf32, #tpu.memory_space<vmem>>, vector<1x32x32xf32>
    %133 = vector.shape_cast %132 : vector<1x32x32xf32> to vector<32x32xf32>
    %cst_49 = arith.constant dense<0.000000e+00> : vector<6x32xf32>
    %134 = tpu.matmul %131, %133, %cst_49 {dimension_numbers = #tpu.dot_dimension_numbers<[1], [0], [0], [1], [0, 0, 1, 1], [], []>} : vector<6x32xf32>, vector<32x32xf32>, vector<6x32xf32> -> vector<6x32xf32>
    %c9 = arith.constant 9 : index
    %c0_50 = arith.constant 0 : index
    %135 = vector.load %arg3[%c9, %c0_50] : memref<48x32xf32, #tpu.memory_space<vmem>>, vector<1x32xf32>
    %136 = vector.broadcast %135 : vector<1x32xf32> to vector<6x32xf32>
    %137 = arith.addf %134, %136 : vector<6x32xf32>
    %c16 = arith.constant 16 : index
    %c0_51 = arith.constant 0 : index
    %138 = vector.load %arg3[%c16, %c0_51] : memref<48x32xf32, #tpu.memory_space<vmem>>, vector<8x32xf32>
    %c5_52 = arith.constant 5 : index
    %c0_53 = arith.constant 0 : index
    %c0_54 = arith.constant 0 : index
    %139 = vector.load %arg2[%c5_52, %c0_53, %c0_54] : memref<10x32x128xf32, #tpu.memory_space<vmem>>, vector<1x32x64xf32>
    %140 = vector.shape_cast %139 : vector<1x32x64xf32> to vector<32x64xf32>
    %cst_55 = arith.constant dense<0.000000e+00> : vector<8x64xf32>
    %141 = tpu.matmul %138, %140, %cst_55 {dimension_numbers = #tpu.dot_dimension_numbers<[1], [0], [0], [1], [0, 0, 1, 1], [], []>} : vector<8x32xf32>, vector<32x64xf32>, vector<8x64xf32> -> vector<8x64xf32>
    %142 = vector.extract_strided_slice %141 {offsets = [0, 0], sizes = [8, 32], strides = [1, 1]} : vector<8x64xf32> to vector<8x32xf32>
    %c11 = arith.constant 11 : index
    %c0_56 = arith.constant 0 : index
    %143 = vector.load %arg3[%c11, %c0_56] : memref<48x32xf32, #tpu.memory_space<vmem>>, vector<1x32xf32>
    %144 = vector.broadcast %143 : vector<1x32xf32> to vector<8x32xf32>
    %145 = arith.addf %142, %144 : vector<8x32xf32>
    %146 = vector.extract_strided_slice %141 {offsets = [0, 32], sizes = [8, 32], strides = [1, 1]} : vector<8x64xf32> to vector<8x32xf32>
    %c12 = arith.constant 12 : index
    %c0_57 = arith.constant 0 : index
    %147 = vector.load %arg3[%c12, %c0_57] : memref<48x32xf32, #tpu.memory_space<vmem>>, vector<1x32xf32>
    %148 = vector.broadcast %147 : vector<1x32xf32> to vector<8x32xf32>
    %149 = arith.addf %146, %148 : vector<8x32xf32>
    %c4_58 = arith.constant 4 : index
    %c0_59 = arith.constant 0 : index
    %c0_60 = arith.constant 0 : index
    %150 = vector.load %arg2[%c4_58, %c0_59, %c0_60] : memref<10x32x128xf32, #tpu.memory_space<vmem>>, vector<1x32x32xf32>
    %151 = vector.shape_cast %150 : vector<1x32x32xf32> to vector<32x32xf32>
    %cst_61 = arith.constant dense<0.000000e+00> : vector<6x32xf32>
    %152 = tpu.matmul %137, %151, %cst_61 {dimension_numbers = #tpu.dot_dimension_numbers<[1], [0], [0], [1], [0, 0, 1, 1], [], []>} : vector<6x32xf32>, vector<32x32xf32>, vector<6x32xf32> -> vector<6x32xf32>
    %c10 = arith.constant 10 : index
    %c0_62 = arith.constant 0 : index
    %153 = vector.load %arg3[%c10, %c0_62] : memref<48x32xf32, #tpu.memory_space<vmem>>, vector<1x32xf32>
    %154 = vector.broadcast %153 : vector<1x32xf32> to vector<6x32xf32>
    %155 = arith.addf %152, %154 : vector<6x32xf32>
    %cst_63 = arith.constant 5.000000e-01 : f32
    %156 = vector.broadcast %cst_63 : f32 to vector<6x32xf32>
    %157 = arith.mulf %155, %156 : vector<6x32xf32>
    %c9_64 = arith.constant 9 : index
    %c0_65 = arith.constant 0 : index
    %c0_66 = arith.constant 0 : index
    %158 = vector.load %arg2[%c9_64, %c0_65, %c0_66] : memref<10x32x128xf32, #tpu.memory_space<vmem>>, vector<1x32x8xf32>
    %159 = vector.shape_cast %158 : vector<1x32x8xf32> to vector<32x8xf32>
    %c40 = arith.constant 40 : index
    %c0_67 = arith.constant 0 : index
    %160 = vector.load %arg3[%c40, %c0_67] : memref<48x32xf32, #tpu.memory_space<vmem>>, vector<8x32xf32>
    %161 = vector.extract_strided_slice %145 {offsets = [0, 0], sizes = [1, 32], strides = [1, 1]} : vector<8x32xf32> to vector<1x32xf32>
    %162 = vector.broadcast %161 : vector<1x32xf32> to vector<6x32xf32>
    %163 = arith.mulf %157, %162 : vector<6x32xf32>
    %cst_68 = arith.constant dense<0.000000e+00> : vector<6x8xf32>
    %164 = tpu.matmul %163, %159, %cst_68 {dimension_numbers = #tpu.dot_dimension_numbers<[1], [0], [0], [1], [0, 0, 1, 1], [], []>} : vector<6x32xf32>, vector<32x8xf32>, vector<6x8xf32> -> vector<6x8xf32>
    %165 = vector.extract_strided_slice %145 {offsets = [1, 0], sizes = [1, 32], strides = [1, 1]} : vector<8x32xf32> to vector<1x32xf32>
    %166 = vector.broadcast %165 : vector<1x32xf32> to vector<6x32xf32>
    %167 = arith.mulf %157, %166 : vector<6x32xf32>
    %cst_69 = arith.constant dense<0.000000e+00> : vector<6x8xf32>
    %168 = tpu.matmul %167, %159, %cst_69 {dimension_numbers = #tpu.dot_dimension_numbers<[1], [0], [0], [1], [0, 0, 1, 1], [], []>} : vector<6x32xf32>, vector<32x8xf32>, vector<6x8xf32> -> vector<6x8xf32>
    %169 = vector.extract_strided_slice %145 {offsets = [2, 0], sizes = [1, 32], strides = [1, 1]} : vector<8x32xf32> to vector<1x32xf32>
    %170 = vector.broadcast %169 : vector<1x32xf32> to vector<6x32xf32>
    %171 = arith.mulf %157, %170 : vector<6x32xf32>
    %cst_70 = arith.constant dense<0.000000e+00> : vector<6x8xf32>
    %172 = tpu.matmul %171, %159, %cst_70 {dimension_numbers = #tpu.dot_dimension_numbers<[1], [0], [0], [1], [0, 0, 1, 1], [], []>} : vector<6x32xf32>, vector<32x8xf32>, vector<6x8xf32> -> vector<6x8xf32>
    %173 = vector.extract_strided_slice %145 {offsets = [3, 0], sizes = [1, 32], strides = [1, 1]} : vector<8x32xf32> to vector<1x32xf32>
    %174 = vector.broadcast %173 : vector<1x32xf32> to vector<6x32xf32>
    %175 = arith.mulf %157, %174 : vector<6x32xf32>
    %cst_71 = arith.constant dense<0.000000e+00> : vector<6x8xf32>
    %176 = tpu.matmul %175, %159, %cst_71 {dimension_numbers = #tpu.dot_dimension_numbers<[1], [0], [0], [1], [0, 0, 1, 1], [], []>} : vector<6x32xf32>, vector<32x8xf32>, vector<6x8xf32> -> vector<6x8xf32>
    %177 = vector.extract_strided_slice %145 {offsets = [4, 0], sizes = [1, 32], strides = [1, 1]} : vector<8x32xf32> to vector<1x32xf32>
    %178 = vector.broadcast %177 : vector<1x32xf32> to vector<6x32xf32>
    %179 = arith.mulf %157, %178 : vector<6x32xf32>
    %cst_72 = arith.constant dense<0.000000e+00> : vector<6x8xf32>
    %180 = tpu.matmul %179, %159, %cst_72 {dimension_numbers = #tpu.dot_dimension_numbers<[1], [0], [0], [1], [0, 0, 1, 1], [], []>} : vector<6x32xf32>, vector<32x8xf32>, vector<6x8xf32> -> vector<6x8xf32>
    %181 = vector.extract_strided_slice %145 {offsets = [5, 0], sizes = [1, 32], strides = [1, 1]} : vector<8x32xf32> to vector<1x32xf32>
    %182 = vector.broadcast %181 : vector<1x32xf32> to vector<6x32xf32>
    %183 = arith.mulf %157, %182 : vector<6x32xf32>
    %cst_73 = arith.constant dense<0.000000e+00> : vector<6x8xf32>
    %184 = tpu.matmul %183, %159, %cst_73 {dimension_numbers = #tpu.dot_dimension_numbers<[1], [0], [0], [1], [0, 0, 1, 1], [], []>} : vector<6x32xf32>, vector<32x8xf32>, vector<6x8xf32> -> vector<6x8xf32>
    %185 = vector.extract_strided_slice %145 {offsets = [6, 0], sizes = [1, 32], strides = [1, 1]} : vector<8x32xf32> to vector<1x32xf32>
    %186 = vector.broadcast %185 : vector<1x32xf32> to vector<6x32xf32>
    %187 = arith.mulf %157, %186 : vector<6x32xf32>
    %cst_74 = arith.constant dense<0.000000e+00> : vector<6x8xf32>
    %188 = tpu.matmul %187, %159, %cst_74 {dimension_numbers = #tpu.dot_dimension_numbers<[1], [0], [0], [1], [0, 0, 1, 1], [], []>} : vector<6x32xf32>, vector<32x8xf32>, vector<6x8xf32> -> vector<6x8xf32>
    %189 = vector.extract_strided_slice %145 {offsets = [7, 0], sizes = [1, 32], strides = [1, 1]} : vector<8x32xf32> to vector<1x32xf32>
    %190 = vector.broadcast %189 : vector<1x32xf32> to vector<6x32xf32>
    %191 = arith.mulf %157, %190 : vector<6x32xf32>
    %cst_75 = arith.constant dense<0.000000e+00> : vector<6x8xf32>
    %192 = tpu.matmul %191, %159, %cst_75 {dimension_numbers = #tpu.dot_dimension_numbers<[1], [0], [0], [1], [0, 0, 1, 1], [], []>} : vector<6x32xf32>, vector<32x8xf32>, vector<6x8xf32> -> vector<6x8xf32>
    %193 = arith.maximumf %164, %168 : vector<6x8xf32>
    %194 = arith.maximumf %193, %172 : vector<6x8xf32>
    %195 = arith.maximumf %194, %176 : vector<6x8xf32>
    %196 = arith.maximumf %195, %180 : vector<6x8xf32>
    %197 = arith.maximumf %196, %184 : vector<6x8xf32>
    %198 = arith.maximumf %197, %188 : vector<6x8xf32>
    %199 = arith.maximumf %198, %192 : vector<6x8xf32>
    %200 = arith.subf %164, %199 : vector<6x8xf32>
    %201 = math.exp %200 : vector<6x8xf32>
    %202 = arith.subf %168, %199 : vector<6x8xf32>
    %203 = math.exp %202 : vector<6x8xf32>
    %204 = arith.subf %172, %199 : vector<6x8xf32>
    %205 = math.exp %204 : vector<6x8xf32>
    %206 = arith.subf %176, %199 : vector<6x8xf32>
    %207 = math.exp %206 : vector<6x8xf32>
    %208 = arith.subf %180, %199 : vector<6x8xf32>
    %209 = math.exp %208 : vector<6x8xf32>
    %210 = arith.subf %184, %199 : vector<6x8xf32>
    %211 = math.exp %210 : vector<6x8xf32>
    %212 = arith.subf %188, %199 : vector<6x8xf32>
    %213 = math.exp %212 : vector<6x8xf32>
    %214 = arith.subf %192, %199 : vector<6x8xf32>
    %215 = math.exp %214 : vector<6x8xf32>
    %216 = arith.addf %201, %203 : vector<6x8xf32>
    %217 = arith.addf %216, %205 : vector<6x8xf32>
    %218 = arith.addf %217, %207 : vector<6x8xf32>
    %219 = arith.addf %218, %209 : vector<6x8xf32>
    %220 = arith.addf %219, %211 : vector<6x8xf32>
    %221 = arith.addf %220, %213 : vector<6x8xf32>
    %222 = arith.addf %221, %215 : vector<6x8xf32>
    %223 = tpu.reciprocal %222 {approx = true} : vector<6x8xf32> -> vector<6x8xf32>
    %224 = arith.mulf %201, %223 : vector<6x8xf32>
    %cst_76 = arith.constant dense<0.000000e+00> : vector<6x32xf32>
    %225 = tpu.matmul %224, %160, %cst_76 {dimension_numbers = #tpu.dot_dimension_numbers<[1], [0], [0], [1], [0, 0, 1, 1], [], []>} : vector<6x8xf32>, vector<8x32xf32>, vector<6x32xf32> -> vector<6x32xf32>
    %226 = vector.extract_strided_slice %149 {offsets = [0, 0], sizes = [1, 32], strides = [1, 1]} : vector<8x32xf32> to vector<1x32xf32>
    %227 = vector.broadcast %226 : vector<1x32xf32> to vector<6x32xf32>
    %228 = arith.mulf %225, %227 : vector<6x32xf32>
    %229 = arith.mulf %203, %223 : vector<6x8xf32>
    %cst_77 = arith.constant dense<0.000000e+00> : vector<6x32xf32>
    %230 = tpu.matmul %229, %160, %cst_77 {dimension_numbers = #tpu.dot_dimension_numbers<[1], [0], [0], [1], [0, 0, 1, 1], [], []>} : vector<6x8xf32>, vector<8x32xf32>, vector<6x32xf32> -> vector<6x32xf32>
    %231 = vector.extract_strided_slice %149 {offsets = [1, 0], sizes = [1, 32], strides = [1, 1]} : vector<8x32xf32> to vector<1x32xf32>
    %232 = vector.broadcast %231 : vector<1x32xf32> to vector<6x32xf32>
    %233 = arith.mulf %230, %232 : vector<6x32xf32>
    %234 = arith.addf %228, %233 : vector<6x32xf32>
    %235 = arith.mulf %205, %223 : vector<6x8xf32>
    %cst_78 = arith.constant dense<0.000000e+00> : vector<6x32xf32>
    %236 = tpu.matmul %235, %160, %cst_78 {dimension_numbers = #tpu.dot_dimension_numbers<[1], [0], [0], [1], [0, 0, 1, 1], [], []>} : vector<6x8xf32>, vector<8x32xf32>, vector<6x32xf32> -> vector<6x32xf32>
    %237 = vector.extract_strided_slice %149 {offsets = [2, 0], sizes = [1, 32], strides = [1, 1]} : vector<8x32xf32> to vector<1x32xf32>
    %238 = vector.broadcast %237 : vector<1x32xf32> to vector<6x32xf32>
    %239 = arith.mulf %236, %238 : vector<6x32xf32>
    %240 = arith.addf %234, %239 : vector<6x32xf32>
    %241 = arith.mulf %207, %223 : vector<6x8xf32>
    %cst_79 = arith.constant dense<0.000000e+00> : vector<6x32xf32>
    %242 = tpu.matmul %241, %160, %cst_79 {dimension_numbers = #tpu.dot_dimension_numbers<[1], [0], [0], [1], [0, 0, 1, 1], [], []>} : vector<6x8xf32>, vector<8x32xf32>, vector<6x32xf32> -> vector<6x32xf32>
    %243 = vector.extract_strided_slice %149 {offsets = [3, 0], sizes = [1, 32], strides = [1, 1]} : vector<8x32xf32> to vector<1x32xf32>
    %244 = vector.broadcast %243 : vector<1x32xf32> to vector<6x32xf32>
    %245 = arith.mulf %242, %244 : vector<6x32xf32>
    %246 = arith.addf %240, %245 : vector<6x32xf32>
    %247 = arith.mulf %209, %223 : vector<6x8xf32>
    %cst_80 = arith.constant dense<0.000000e+00> : vector<6x32xf32>
    %248 = tpu.matmul %247, %160, %cst_80 {dimension_numbers = #tpu.dot_dimension_numbers<[1], [0], [0], [1], [0, 0, 1, 1], [], []>} : vector<6x8xf32>, vector<8x32xf32>, vector<6x32xf32> -> vector<6x32xf32>
    %249 = vector.extract_strided_slice %149 {offsets = [4, 0], sizes = [1, 32], strides = [1, 1]} : vector<8x32xf32> to vector<1x32xf32>
    %250 = vector.broadcast %249 : vector<1x32xf32> to vector<6x32xf32>
    %251 = arith.mulf %248, %250 : vector<6x32xf32>
    %252 = arith.addf %246, %251 : vector<6x32xf32>
    %253 = arith.mulf %211, %223 : vector<6x8xf32>
    %cst_81 = arith.constant dense<0.000000e+00> : vector<6x32xf32>
    %254 = tpu.matmul %253, %160, %cst_81 {dimension_numbers = #tpu.dot_dimension_numbers<[1], [0], [0], [1], [0, 0, 1, 1], [], []>} : vector<6x8xf32>, vector<8x32xf32>, vector<6x32xf32> -> vector<6x32xf32>
    %255 = vector.extract_strided_slice %149 {offsets = [5, 0], sizes = [1, 32], strides = [1, 1]} : vector<8x32xf32> to vector<1x32xf32>
    %256 = vector.broadcast %255 : vector<1x32xf32> to vector<6x32xf32>
    %257 = arith.mulf %254, %256 : vector<6x32xf32>
    %258 = arith.addf %252, %257 : vector<6x32xf32>
    %259 = arith.mulf %213, %223 : vector<6x8xf32>
    %cst_82 = arith.constant dense<0.000000e+00> : vector<6x32xf32>
    %260 = tpu.matmul %259, %160, %cst_82 {dimension_numbers = #tpu.dot_dimension_numbers<[1], [0], [0], [1], [0, 0, 1, 1], [], []>} : vector<6x8xf32>, vector<8x32xf32>, vector<6x32xf32> -> vector<6x32xf32>
    %261 = vector.extract_strided_slice %149 {offsets = [6, 0], sizes = [1, 32], strides = [1, 1]} : vector<8x32xf32> to vector<1x32xf32>
    %262 = vector.broadcast %261 : vector<1x32xf32> to vector<6x32xf32>
    %263 = arith.mulf %260, %262 : vector<6x32xf32>
    %264 = arith.addf %258, %263 : vector<6x32xf32>
    %265 = arith.mulf %215, %223 : vector<6x8xf32>
    %cst_83 = arith.constant dense<0.000000e+00> : vector<6x32xf32>
    %266 = tpu.matmul %265, %160, %cst_83 {dimension_numbers = #tpu.dot_dimension_numbers<[1], [0], [0], [1], [0, 0, 1, 1], [], []>} : vector<6x8xf32>, vector<8x32xf32>, vector<6x32xf32> -> vector<6x32xf32>
    %267 = vector.extract_strided_slice %149 {offsets = [7, 0], sizes = [1, 32], strides = [1, 1]} : vector<8x32xf32> to vector<1x32xf32>
    %268 = vector.broadcast %267 : vector<1x32xf32> to vector<6x32xf32>
    %269 = arith.mulf %266, %268 : vector<6x32xf32>
    %270 = arith.addf %264, %269 : vector<6x32xf32>
    %c6_84 = arith.constant 6 : index
    %c0_85 = arith.constant 0 : index
    %c0_86 = arith.constant 0 : index
    %271 = vector.load %arg2[%c6_84, %c0_85, %c0_86] : memref<10x32x128xf32, #tpu.memory_space<vmem>>, vector<1x32x32xf32>
    %272 = vector.shape_cast %271 : vector<1x32x32xf32> to vector<32x32xf32>
    %cst_87 = arith.constant dense<0.000000e+00> : vector<6x32xf32>
    %273 = tpu.matmul %270, %272, %cst_87 {dimension_numbers = #tpu.dot_dimension_numbers<[1], [0], [0], [1], [0, 0, 1, 1], [], []>} : vector<6x32xf32>, vector<32x32xf32>, vector<6x32xf32> -> vector<6x32xf32>
    %c13 = arith.constant 13 : index
    %c0_88 = arith.constant 0 : index
    %274 = vector.load %arg3[%c13, %c0_88] : memref<48x32xf32, #tpu.memory_space<vmem>>, vector<1x32xf32>
    %275 = vector.broadcast %274 : vector<1x32xf32> to vector<6x32xf32>
    %276 = arith.addf %273, %275 : vector<6x32xf32>
    %c7_89 = arith.constant 7 : index
    %c0_90 = arith.constant 0 : index
    %c0_91 = arith.constant 0 : index
    %277 = vector.load %arg2[%c7_89, %c0_90, %c0_91] : memref<10x32x128xf32, #tpu.memory_space<vmem>>, vector<1x32x32xf32>
    %278 = vector.shape_cast %277 : vector<1x32x32xf32> to vector<32x32xf32>
    %cst_92 = arith.constant dense<0.000000e+00> : vector<6x32xf32>
    %279 = tpu.matmul %276, %278, %cst_92 {dimension_numbers = #tpu.dot_dimension_numbers<[1], [0], [0], [1], [0, 0, 1, 1], [], []>} : vector<6x32xf32>, vector<32x32xf32>, vector<6x32xf32> -> vector<6x32xf32>
    %c14 = arith.constant 14 : index
    %c0_93 = arith.constant 0 : index
    %280 = vector.load %arg3[%c14, %c0_93] : memref<48x32xf32, #tpu.memory_space<vmem>>, vector<1x32xf32>
    %281 = vector.broadcast %280 : vector<1x32xf32> to vector<6x32xf32>
    %282 = arith.addf %279, %281 : vector<6x32xf32>
    %cst_94 = arith.constant 5.000000e-01 : f32
    %283 = vector.broadcast %cst_94 : f32 to vector<6x32xf32>
    %284 = arith.mulf %283, %282 : vector<6x32xf32>
    %cst_95 = arith.constant 4.471500e-02 : f32
    %285 = vector.broadcast %cst_95 : f32 to vector<6x32xf32>
    %286 = arith.mulf %285, %282 : vector<6x32xf32>
    %287 = arith.mulf %286, %282 : vector<6x32xf32>
    %288 = arith.mulf %287, %282 : vector<6x32xf32>
    %289 = arith.addf %282, %288 : vector<6x32xf32>
    %cst_96 = arith.constant 0.797884583 : f32
    %290 = vector.broadcast %cst_96 : f32 to vector<6x32xf32>
    %291 = arith.mulf %290, %289 : vector<6x32xf32>
    %292 = math.tanh %291 : vector<6x32xf32>
    %cst_97 = arith.constant 1.000000e+00 : f32
    %293 = vector.broadcast %cst_97 : f32 to vector<6x32xf32>
    %294 = arith.addf %293, %292 : vector<6x32xf32>
    %295 = arith.mulf %284, %294 : vector<6x32xf32>
    %296 = vector.extract_strided_slice %295 {offsets = [0, 0], sizes = [2, 32], strides = [1, 1]} : vector<6x32xf32> to vector<2x32xf32>
    %c0_98 = arith.constant 0 : index
    %c0_99 = arith.constant 0 : index
    %c0_100 = arith.constant 0 : index
    %297 = vector.load %arg4[%c0_98, %c0_99, %c0_100] : memref<2x3x32xf32, #tpu.memory_space<vmem>>, vector<2x1x32xf32>
    %298 = vector.shape_cast %297 : vector<2x1x32xf32> to vector<2x32xf32>
    %299 = vector.shape_cast %296 : vector<2x32xf32> to vector<2x1x32xf32>
    tpu.vector_store %arg4[%c0_98, %c0_99, %c0_100], %299 {strides = array<i32>} : memref<2x3x32xf32, #tpu.memory_space<vmem>>, vector<2x1x32xf32>,
    %300 = vector.extract_strided_slice %295 {offsets = [2, 0], sizes = [2, 32], strides = [1, 1]} : vector<6x32xf32> to vector<2x32xf32>
    %c0_101 = arith.constant 0 : index
    %c1_102 = arith.constant 1 : index
    %c0_103 = arith.constant 0 : index
    %301 = vector.load %arg4[%c0_101, %c1_102, %c0_103] : memref<2x3x32xf32, #tpu.memory_space<vmem>>, vector<2x1x32xf32>
    %302 = vector.shape_cast %301 : vector<2x1x32xf32> to vector<2x32xf32>
    %303 = vector.shape_cast %300 : vector<2x32xf32> to vector<2x1x32xf32>
    tpu.vector_store %arg4[%c0_101, %c1_102, %c0_103], %303 {strides = array<i32>} : memref<2x3x32xf32, #tpu.memory_space<vmem>>, vector<2x1x32xf32>,
    %304 = vector.extract_strided_slice %295 {offsets = [4, 0], sizes = [2, 32], strides = [1, 1]} : vector<6x32xf32> to vector<2x32xf32>
    %c0_104 = arith.constant 0 : index
    %c2_105 = arith.constant 2 : index
    %c0_106 = arith.constant 0 : index
    %305 = vector.load %arg4[%c0_104, %c2_105, %c0_106] : memref<2x3x32xf32, #tpu.memory_space<vmem>>, vector<2x1x32xf32>
    %306 = vector.shape_cast %305 : vector<2x1x32xf32> to vector<2x32xf32>
    %307 = vector.shape_cast %304 : vector<2x32xf32> to vector<2x1x32xf32>
    tpu.vector_store %arg4[%c0_104, %c2_105, %c0_106], %307 {strides = array<i32>} : memref<2x3x32xf32, #tpu.memory_space<vmem>>, vector<2x1x32xf32>,
    return
  }
  func.func @transform_0(%arg0: i32) -> (i32, i32) {
    %c0_i32 = arith.constant 0 : i32
    %c0_i32_0 = arith.constant 0 : i32
    return %arg0, %c0_i32 : i32, i32
  }
  func.func @transform_1(%arg0: i32) -> (i32, i32, i32) {
    %c0_i32 = arith.constant 0 : i32
    %c0_i32_0 = arith.constant 0 : i32
    %c0_i32_1 = arith.constant 0 : i32
    %c0_i32_2 = arith.constant 0 : i32
    return %c0_i32, %c0_i32_0, %c0_i32_1 : i32, i32, i32
  }
  func.func @transform_2(%arg0: i32) -> (i32, i32) {
    %c0_i32 = arith.constant 0 : i32
    %c0_i32_0 = arith.constant 0 : i32
    %c0_i32_1 = arith.constant 0 : i32
    return %c0_i32, %c0_i32_0 : i32, i32
  }
  func.func @transform_3(%arg0: i32) -> (i32, i32, i32) {
    %c0_i32 = arith.constant 0 : i32
    %c0_i32_0 = arith.constant 0 : i32
    %c0_i32_1 = arith.constant 0 : i32
    return %arg0, %c0_i32, %c0_i32_0 : i32, i32, i32
  }
}

</mosaic_0001>

<bundles_post_ra>
// kernel: tpu_custom_call.1
= control target key start
LH: loop header
LB: loop body
LE: loop exit
PB: predicated region body
PF: predicated region fallthrough
CT: control target
= control target key end

     0   :  { %8 = vsyncpa [#allocation3], 0  ;;  %s3251_s12 = smov [#allocation2]   ;;  %s3670_s0 = inlined_call_operand.vmem [shape: f32[2,32], index: 0, kind: input, shape index: {}]   ;;  %s3671_s1 = inlined_call_operand.hbm [shape: f32[10,32,128], index: 1, kind: input, shape index: {}]   ;;  %s3672_s2 = inlined_call_operand.vmem [shape: f32[48,32], index: 2, kind: input, shape index: {}]   ;;  %s3673_s3 = inlined_call_operand.vmem [shape: f32[2,3,32], index: 3, kind: output, shape index: {}]  }
   0x1   :  { %s16_s13 = sshll.u32 %s3251_s12, 4  ;;  %s17_s13 = int_to_ptr.vmem [resolvable:$true] %s16_s13 }
   0x2   :  { %s3237_s14 = scalar_lea.vmem %s17_s13, 5120  ;;  %p3242_p1 = scmp.lt.s32.totalorder %s17_s13, %s17_s13 }
   0x3   :  { %p3238_p0 = scmp.ne.s32.totalorder %s17_s13, %s3237_s14  ;;  %p3243_p2 = scmp.lt.s32.totalorder %s3237_s14, %s3237_s14 }
   0x5   :  { %p3244_p3 = por %p3243_p2, %p3242_p1 }
   0x7   :  { %p3245_p4 = pnand %p3244_p3, %p3238_p0 }
   0x9   :  { %3248 = shalt.err (!%p3245_p4)
}
   0xa   :  { %s3252_s15 = smov 128   ;;  %s3253_s16 = smov 8  }
   0xb   :  { %22 = dma.hbm_to_vmem [thread:$0]  %s3671_s1, 5120, %s17_s13, [#allocation3], %s3252_s15, %s3252_s15, %s3253_s16  }
   0xc   :  { %3249 = dma.done.wait [#allocation3], 5120  }
   0xd   :  { %3250 = vsyncadd [#allocation3], 4294962176  ;;  %v3254_v0 = vmov 0.0   ;;  %vm3255_vm0 = vmmov 0   ;;  %v32_v1 = vld [vmem:[#allocation2 + $0x18] sm:$0xff]  ;;  %v31_v2 = vld [vmem:[#allocation2 + $0x10] sm:$0xff] }
   0xe   :  { %2912 = vmatprep.subr.mxu0 %v3254_v0  ;;  %2920 = vmatprep.mubr.msk.f32.mxu0 %vm3255_vm0, %v3254_v0  ;;  %v2749_v3 = vld [vmem:[%s3672_s2 + $0x1] ss:$0 sm:$0xff]  ;;  %v30_v4 = vld [vmem:[#allocation2 + $0x8] sm:$0xff]  ;;  %s3256_s1 = smov 32   ;;  %v2750_v5 = vld [vmem:[%s3672_s2 + $0x2] ss:$0 sm:$0xff] }
   0xf   :  { %2923 = vmatprep.subr.mxu1 %v3254_v0  ;;  %2931 = vmatprep.mubr.msk.f32.mxu1 %vm3255_vm0, %v3254_v0  ;;  %v29_v6 = vld [vmem:[#allocation2] sm:$0xff]  ;;  %vm33_vm1 = vcmask 261120   ;;  %s3257_s25 = smov 64   ;;  %v171_v8 = vld [vmem:[#allocation2 + $0x38] sm:$0xff]  ;;  %v170_v20 = vld [vmem:[#allocation2 + $0x30] sm:$0xff]  ;;  %s3258_s27 = smov 96  }
  0x10   :  { %2913 = vmatpush3.msra.mxu0 %v32_v1  ;;  %128 = vrot.lane.b32.xlu0 %v2749_v3, %s3256_s1  ;;  %v28_v7 = vld [vmem:[%s3670_s0] sm:$0x3]  ;;  %v169_v21 = vld [vmem:[#allocation2 + $0x28] sm:$0xff]  ;;  %v2753_v23 = vld [vmem:[%s3672_s2 + $0x4] ss:$0 sm:$0xff]  ;;  %vm163_vm3 = vcmask 1041408  }
  0x11   :  { %2914 = vmatprep.subr.mxu0 %v3254_v0  ;;  %2924 = vmatpush3.msra.mxu1 %v171_v8  ;;  %v168_v22 = vld [vmem:[#allocation2 + $0x20] sm:$0xff]  ;;  %vm165_vm4 = vcmask 1043456   ;;  %v276_v46 = vld [vmem:[#allocation2 + $0x118] sm:$0xff]  ;;  %v275_v47 = vld [vmem:[#allocation2 + $0x110] sm:$0xff]  ;;  %vm548_vm5 = vcmask 130048   ;;  %vm878_vm6 = vcmask 259072  }
  0x12   :  { %2915 = vmatpush3.msra.mxu0 %v31_v2  ;;  %2925 = vmatprep.subr.mxu1 %v3254_v0  ;;  %v2748_v31 = vld [vmem:[%s3672_s2] ss:$0 sm:$0xff]  ;;  %v274_v48 = vld [vmem:[#allocation2 + $0x108] sm:$0xff]  ;;  %v2754_v62 = vld [vmem:[%s3672_s2 + $0x5] ss:$0 sm:$0xff]  ;;  %vm1835_vm7 = vcmask 64512  }
  0x13   :  { %2916 = vmatprep.subr.mxu0 %v3254_v0  ;;  %2926 = vmatpush3.msra.mxu1 %v170_v20  ;;  %v273_v49 = vld [vmem:[#allocation2 + $0x100] sm:$0xff]  ;;  %vm2706_vm8 = vcmask 253952  }
  0x14   :  { %2917 = vmatpush3.msra.mxu0 %v30_v4  ;;  %148 = vrot.lane.b32.xlu0 %v2750_v5, %s3257_s25  ;;  %v2752_v1 = vld [vmem:[%s3672_s2 + $0x3] ss:$0 sm:$0xff] }
  0x15   :  { %2918 = vmatprep.subr.mxu0 %v3254_v0  ;;  %2927 = vmatprep.subr.mxu1 %v3254_v0 }
  0x16   :  { %2919 = vmatpush3.msra.mxu0 %v29_v6  ;;  %2928 = vmatpush3.msra.mxu1 %v169_v21  ;;  %v278_v21 = vld [vmem:[%s3672_s2 + $0x20] sm:$0xff] }
  0x17   :  { %2921 = vmatmul.mubr.msk.f32.vlgmr.msra.gmra.mxu0 %vm33_vm1, %v28_v7  ;;  %2934 = vmatprep.subr.mxu0 %v3254_v0 }
  0x18   :  { %2942 = vmatprep.mubr.msk.f32.mxu0 %vm3255_vm0, %v3254_v0  ;;  %2929 = vmatprep.subr.mxu1 %v3254_v0 }
  0x19   :  { %2930 = vmatpush3.msra.mxu1 %v168_v22  ;;  %258 = vrot.lane.b32.xlu0 %v2753_v23, %s3256_s1  ;;  %v277_v22 = vld [vmem:[%s3672_s2 + $0x18] sm:$0xff] }
  0x1a   :  { %2945 = vmatprep.subr.mxu1 %v3254_v0  ;;  %2935 = vmatpush3.msra.mxu0 %v276_v46 }
  0x1b   :  { %2936 = vmatprep.subr.mxu0 %v3254_v0 }
  0x1c   :  { %2937 = vmatpush3.msra.mxu0 %v275_v47 }
  0x1d   :  { %2938 = vmatprep.subr.mxu0 %v3254_v0 }
  0x1e   :  { %2939 = vmatpush3.msra.mxu0 %v274_v48 }
  0x1f   :  { %2940 = vmatprep.subr.mxu0 %v3254_v0 }
  0x20   :  { %2941 = vmatpush3.msra.mxu0 %v273_v49 }
  0x21   :  { %2956 = vmatprep.subr.mxu0 %v3254_v0 }
  0x82   :  { %v129_v9 = vpop.permute.xlu0 %128 }
  0x86   :  { %v149_v18 = vpop.permute.xlu0 %148 }
  0x8b   :  { %v259_v50 = vpop.permute.xlu0 %258 }
  0xd7   :  { %v103_v10 = vpop.f32.mrf.mxu0 }
  0xd8   :  { %v131_v11 = vadd.f32 %v129_v9, %v103_v10  ;;  %v151_v19 = vadd.f32 %v149_v18, %v103_v10  ;;  %v112_v32 = vadd.f32 %v2748_v31, %v103_v10 }
  0xd9   :  { %v2922_v12 = vpop.f32.mrf.mxu0 }
  0xda   :  { %v132_v13 = vand.u32 2147483647, %v131_v11  ;;  %vm136_vm2 = vcmp.ge.f32.partialorder %v131_v11, 0.0  ;;  %v114_v33 = vmul.f32 0.044715, %v112_v32  ;;  %v113_v41 = vmul.f32 0.5, %v112_v32 }
  0xdc   :  { %v133_v14 = vsub.f32 0.0, %v132_v13  ;;  %v115_v34 = vmul.f32 %v114_v33, %v112_v32 }
  0xde   :  { %v134_v15 = vmul.f32 1.442695, %v133_v14  ;;  %v116_v35 = vmul.f32 %v115_v34, %v112_v32 }
  0xe0   :  { %3191 = vpow2.f32 %v134_v15  ;;  %v117_v36 = vadd.f32 %v116_v35, %v112_v32 }
  0xe2   :  { %v118_v37 = vmul.f32 0.7978846, %v117_v36 }
  0xed   :  { %v3192_v16 = vpop.eup %3191 }
  0xee   :  { %v138_v17 = vadd.f32 1.0, %v3192_v16  ;;  %v137_v25 = vsel %vm136_vm2, 1.0, %v3192_v16 }
  0xf0   :  { %3193 = vrcp.f32 %v138_v17 }
  0xf1   :  { %3195 = vtanh.f32 %v151_v19 }
  0xf2   :  { %3197 = vtanh.f32 %v118_v37 }
  0xfd   :  { %v3194_v24 = vpop.eup %3193 }
  0xfe   :  { %v140_v26 = vmul.f32 %v3194_v24, %v137_v25  ;;  %v3196_v29 = vpop.eup %3195 }
  0xff   :  { %v159_v30 = vrot.slane %v3196_v29, 4  ;;  %v3198_v38 = vpop.eup %3197 }
 0x100   :  { %v141_v27 = vmul.f32 %v140_v26, %v131_v11  ;;  %v120_v39 = vadd.f32 1.0, %v3198_v38 }
 0x102   :  { %v154_v28 = vrot.slane %v141_v27, 6  ;;  %v121_v42 = vmul.f32 %v120_v39, %v113_v41 }
 0x104   :  { %155 = vrot.lane.b32.xlu1 %v154_v28, %s3258_s27 }
 0x108   :  { %160 = vrot.lane.b32.xlu1 %v159_v30, %s3257_s25 }
 0x176   :  { %v156_v40 = vpop.permute.xlu1 %155 }
 0x177   :  { %v164_v43 = vsel %vm163_vm3, %v121_v42, %v156_v40 }
 0x17a   :  { %v161_v44 = vpop.permute.xlu1 %160 }
 0x17b   :  { %v166_v45 = vsel %vm165_vm4, %v164_v43, %v161_v44 }
 0x17c   :  { %2932 = vmatmul.mubr.msk.f32.vlgmr.msra.gmra.mxu1 %vm33_vm1, %v166_v45 }
 0x17d   :  { %2953 = vmatprep.mubr.msk.f32.mxu1 %vm3255_vm0, %v3254_v0  ;;  %2946 = vmatpush3.msra.mxu1 %v276_v46 }
 0x17e   :  { %2947 = vmatprep.subr.mxu1 %v3254_v0 }
 0x17f   :  { %2948 = vmatpush3.msra.mxu1 %v275_v47 }
 0x180   :  { %2949 = vmatprep.subr.mxu1 %v3254_v0 }
 0x181   :  { %2950 = vmatpush3.msra.mxu1 %v274_v48 }
 0x182   :  { %2951 = vmatprep.subr.mxu1 %v3254_v0 }
 0x183   :  { %2952 = vmatpush3.msra.mxu1 %v273_v49 }
 0x184   :  { %2967 = vmatprep.subr.mxu1 %v3254_v0 }
 0x23c   :  { %v241_v51 = vpop.f32.mrf.mxu1 }
 0x23d   :  { %v261_v52 = vadd.f32 %v259_v50, %v241_v51  ;;  %v250_v2 = vadd.f32 %v2752_v1, %v241_v51  ;;  %v2761_v1 = vld [vmem:[%s3672_s2 + $0x6] ss:$0 sm:$0xff] }
 0x23e   :  { %v2933_v53 = vpop.f32.mrf.mxu1 }
 0x23f   :  { %v280_v54 = vrot.slane %v261_v52, 6  ;;  %v364_v55 = vrot.slane %v261_v52, 2  ;;  %v282_v56 = vrot.slane %v261_v52, 4  ;;  %v251_v3 = vmul.f32 0.70710677, %v250_v2 }
 0x241   :  { %v366_v57 = vsel %vm163_vm3, %v364_v55, %v261_v52  ;;  %v284_v58 = vsel %vm163_vm3, %v261_v52, %v280_v54  ;;  %v446_v61 = vsel %vm163_vm3, %v282_v56, %v364_v55 }
 0x242   :  { %v367_v59 = vsel %vm165_vm4, %v366_v57, %v280_v54  ;;  %v285_v60 = vsel %vm165_vm4, %v284_v58, %v282_v56  ;;  %v447_v63 = vsel %vm165_vm4, %v446_v61, %v261_v52 }
 0x243   :  { %369 = vrot.lane.b32.xlu0 %v367_v59, %s3258_s27  ;;  %287 = vrot.lane.b32.xlu1 %v285_v60, %s3258_s27 }
 0x247   :  { %268 = vrot.lane.b32.xlu0 %v2754_v62, %s3257_s25  ;;  %449 = vrot.lane.b32.xlu1 %v447_v63, %s3258_s27 }
 0x2b5   :  { %v370_v4 = vpop.permute.xlu0 %369  ;;  %v288_v5 = vpop.permute.xlu1 %287 }
 0x2b6   :  { %v372_v6 = vmul.f32 %v370_v4, %v251_v3  ;;  %v290_v7 = vmul.f32 %v288_v5, %v251_v3 }
 0x2b8   :  { %2943 = vmatmul.mubr.msk.f32.vlgmr.msra.gmra.mxu0 %vm33_vm1, %v290_v7  ;;  %2954 = vmatmul.mubr.msk.f32.vlgmr.msra.gmra.mxu1 %vm33_vm1, %v372_v6 }
 0x2b9   :  { %2957 = vmatpush3.msra.mxu0 %v276_v46  ;;  %v269_v8 = vpop.permute.xlu0 %268  ;;  %2964 = vmatprep.mubr.msk.f32.mxu0 %vm3255_vm0, %v3254_v0  ;;  %v450_v10 = vpop.permute.xlu1 %449  ;;  %v797_v46 = vld [vmem:[#allocation2 + $0x58] sm:$0xff] }
 0x2ba   :  { %v271_v9 = vadd.f32 %v269_v8, %v241_v51  ;;  %2958 = vmatprep.subr.mxu0 %v3254_v0  ;;  %2971 = vmatprep.mubr.msk.f32.mxu1 %vm3255_vm0, %v3254_v0  ;;  %v452_v14 = vmul.f32 %v450_v10, %v251_v3 }
 0x2bb   :  { %2959 = vmatpush3.msra.mxu0 %v275_v47  ;;  %2968 = vmatpush3.msra.mxu1 %v278_v21  ;;  %v796_v47 = vld [vmem:[#allocation2 + $0x50] sm:$0xff] }
 0x2bc   :  { %2960 = vmatprep.subr.mxu0 %v3254_v0  ;;  %v541_v11 = vrot.slane %v271_v9, 6  ;;  %v627_v12 = vrot.slane %v271_v9, 2  ;;  %v543_v13 = vrot.slane %v271_v9, 4  ;;  %2969 = vmatprep.subr.mxu1 %v3254_v0 }
 0x2bd   :  { %2961 = vmatpush3.msra.mxu0 %v274_v48  ;;  %2970 = vmatpush3.msra.mxu1 %v277_v22  ;;  %v795_v48 = vld [vmem:[#allocation2 + $0x48] sm:$0xff] }
 0x2be   :  { %2962 = vmatprep.subr.mxu0 %v3254_v0  ;;  %v629_v15 = vsel %vm163_vm3, %v627_v12, %v271_v9  ;;  %v545_v16 = vsel %vm163_vm3, %v271_v9, %v541_v11  ;;  %v711_v19 = vsel %vm163_vm3, %v543_v13, %v627_v12  ;;  %2974 = vmatprep.subr.mxu1 %v3254_v0  ;;  %v906_v12 = vld [vmem:[#allocation2 + $0x70] sm:$0xff] }
 0x2bf   :  { %2963 = vmatpush3.msra.mxu0 %v273_v49  ;;  %v630_v17 = vsel %vm165_vm4, %v629_v15, %v541_v11  ;;  %v546_v18 = vsel %vm165_vm4, %v545_v16, %v543_v13  ;;  %v712_v20 = vsel %vm165_vm4, %v711_v19, %v271_v9  ;;  %v794_v49 = vld [vmem:[#allocation2 + $0x40] sm:$0xff]  ;;  %v907_v11 = vld [vmem:[#allocation2 + $0x78] sm:$0xff]  ;;  %v905_v13 = vld [vmem:[#allocation2 + $0x68] sm:$0xff] }
 0x2c0   :  { %2965 = vmatmul.mubr.msk.f32.vlgmr.msra.gmra.mxu0 %vm33_vm1, %v452_v14  ;;  %706 = vrot.lane.b32.xlu0 %v630_v17, %s3257_s25  ;;  %v904_v14 = vld [vmem:[#allocation2 + $0x60] sm:$0xff]  ;;  %v991_v15 = vld [vmem:[#allocation2 + $0xb8] sm:$0xff]  ;;  %v990_v16 = vld [vmem:[#allocation2 + $0xb0] sm:$0xff] }
 0x2c1   :  { %623 = vrot.lane.b32.xlu1 %v546_v18, %s3257_s25  ;;  %2981 = vmatprep.subr.mxu0 %v3254_v0  ;;  %v989_v17 = vld [vmem:[#allocation2 + $0xa8] sm:$0xff]  ;;  %v988_v18 = vld [vmem:[#allocation2 + $0xa0] sm:$0xff]  ;;  %v986_v19 = vld [vmem:[%s3672_s2 + $0x10] sm:$0xff] }
 0x2c2   :  { %2985 = vmatprep.mubr.msk.f32.mxu0 %vm3255_vm0, %v3254_v0  ;;  %2982 = vmatpush3.msra.mxu0 %v278_v21 }
 0x2c3   :  { %2983 = vmatprep.subr.mxu0 %v3254_v0 }
 0x2c4   :  { %2984 = vmatpush3.msra.mxu0 %v277_v22 }
 0x2c5   :  { %788 = vrot.lane.b32.xlu1 %v712_v20, %s3257_s25  ;;  %2999 = vmatprep.subr.mxu0 %v3254_v0 }
 0x332   :  { %v707_v55 = vpop.permute.xlu0 %706 }
 0x333   :  { %v624_v50 = vpop.permute.xlu1 %623 }
 0x337   :  { %v789_v59 = vpop.permute.xlu1 %788 }
 0x378   :  { %v360_v23 = vpop.f32.mrf.mxu0  ;;  %v442_v24 = vpop.f32.mrf.mxu1 }
 0x379   :  { %v526_v27 = vmax.f32 %v360_v23, %v442_v24 }
 0x37a   :  { %v2944_v25 = vpop.f32.mrf.mxu0  ;;  %v2955_v26 = vpop.f32.mrf.mxu1 }
 0x37b   :  { %v2764_v26 = vld [vmem:[%s3672_s2 + $0x8] ss:$0 sm:$0xff] }
 0x380   :  { %v522_v28 = vpop.f32.mrf.mxu0 }
 0x381   :  { %v527_v29 = vmax.f32 %v526_v27, %v522_v28 }
 0x382   :  { %v2966_v30 = vpop.f32.mrf.mxu0 }
 0x383   :  { %v528_v31 = vsub.f32 %v360_v23, %v527_v29  ;;  %v531_v32 = vsub.f32 %v442_v24, %v527_v29  ;;  %v534_v33 = vsub.f32 %v522_v28, %v527_v29  ;;  %v2763_v24 = vld [vmem:[%s3672_s2 + $0x7] ss:$0 sm:$0xff]  ;;  %v1085_v29 = vld [vmem:[#allocation2 + $0x98] sm:$0xff]  ;;  %v1084_v30 = vld [vmem:[#allocation2 + $0x90] sm:$0xff] }
 0x385   :  { %v529_v34 = vmul.f32 1.442695, %v528_v31  ;;  %v532_v35 = vmul.f32 1.442695, %v531_v32  ;;  %v535_v36 = vmul.f32 1.442695, %v534_v33 }
 0x386   :  { %v1083_v31 = vld [vmem:[#allocation2 + $0x88] sm:$0xff]  ;;  %v1082_v32 = vld [vmem:[#allocation2 + $0x80] sm:$0xff] }
 0x387   :  { %3199 = vpow2.f32 %v529_v34  ;;  %v2769_v33 = vld [vmem:[%s3672_s2 + $0xc] ss:$0 sm:$0xff]  ;;  %v3428_v34 = vld [vmem:[#allocation2 + $0x138] sm:$0xff] }
 0x388   :  { %3201 = vpow2.f32 %v532_v35 }
 0x389   :  { %3203 = vpow2.f32 %v535_v36 }
 0x394   :  { %v3200_v37 = vpop.eup %3199 }
 0x395   :  { %v3202_v38 = vpop.eup %3201 }
 0x396   :  { %v537_v39 = vadd.f32 %v3202_v38, %v3200_v37  ;;  %v3204_v40 = vpop.eup %3203 }
 0x398   :  { %v538_v41 = vadd.f32 %v3204_v40, %v537_v39 }
 0x39a   :  { %3205 = vrcp.f32 %v538_v41 }
 0x3a7   :  { %v3206_v42 = vpop.eup %3205 }
 0x3a8   :  { %v547_v43 = vmul.f32 %v3206_v42, %v3200_v37  ;;  %v713_v44 = vmul.f32 %v3206_v42, %v3204_v40  ;;  %v631_v45 = vmul.f32 %v3206_v42, %v3202_v38  ;;  %v1171_v37 = vlaneseq }
 0x3aa   :  { %2972 = vmatmul.mubr.msk.f32.vlgmr.msra.gmra.mxu1 %vm548_vm5, %v547_v43  ;;  %2986 = vmatmul.mubr.msk.f32.vlgmr.msra.gmra.mxu0 %vm548_vm5, %v713_v44  ;;  %v3434_v38 = vshrl.u32 %v1171_v37, 7 }
 0x3ab   :  { %2975 = vmatpush3.msra.mxu1 %v278_v21  ;;  %2978 = vmatprep.mubr.msk.f32.mxu1 %vm3255_vm0, %v3254_v0 }
 0x3ac   :  { %2976 = vmatprep.subr.mxu1 %v3254_v0  ;;  %3007 = vmatprep.mubr.msk.f32.mxu0 %vm3255_vm0, %v3254_v0  ;;  %v1251_v39 = vsub.s32 1, %v3434_v38  ;;  %v1173_v40 = vsub.s32 0, %v3434_v38  ;;  %v1407_v43 = vsub.s32 3, %v3434_v38  ;;  %v1329_v44 = vsub.s32 2, %v3434_v38 }
 0x3ad   :  { %2977 = vmatpush3.msra.mxu1 %v277_v22  ;;  %3000 = vmatpush3.msra.mxu0 %v907_v11 }
 0x3ae   :  { %2979 = vmatmul.mubr.msk.f32.vlgmr.msra.gmra.mxu1 %vm548_vm5, %v631_v45  ;;  %2988 = vmatprep.subr.mxu1 %v3254_v0 }
 0x3af   :  { %2996 = vmatprep.mubr.msk.f32.mxu1 %vm3255_vm0, %v3254_v0  ;;  %2989 = vmatpush3.msra.mxu1 %v797_v46 }
 0x3b0   :  { %2990 = vmatprep.subr.mxu1 %v3254_v0  ;;  %3001 = vmatprep.subr.mxu0 %v3254_v0 }
 0x3b1   :  { %2991 = vmatpush3.msra.mxu1 %v796_v47  ;;  %3002 = vmatpush3.msra.mxu0 %v906_v12 }
 0x3b2   :  { %2992 = vmatprep.subr.mxu1 %v3254_v0  ;;  %3003 = vmatprep.subr.mxu0 %v3254_v0 }
 0x3b3   :  { %2993 = vmatpush3.msra.mxu1 %v795_v48  ;;  %3004 = vmatpush3.msra.mxu0 %v905_v13 }
 0x3b4   :  { %2994 = vmatprep.subr.mxu1 %v3254_v0  ;;  %3005 = vmatprep.subr.mxu0 %v3254_v0 }
 0x3b5   :  { %2995 = vmatpush3.msra.mxu1 %v794_v49  ;;  %3006 = vmatpush3.msra.mxu0 %v904_v14  ;;  %v2765_v49 = vld [vmem:[%s3672_s2 + $0x9] ss:$0 sm:$0xff] }
 0x3b6   :  { %3010 = vmatprep.subr.mxu1 %v3254_v0  ;;  %3021 = vmatprep.subr.mxu0 %v3254_v0 }
 0x46a   :  { %v618_v51 = vpop.f32.mrf.mxu1  ;;  %v783_v52 = vpop.f32.mrf.mxu0 }
 0x46b   :  { %v626_v57 = vmul.f32 %v624_v50, %v618_v51  ;;  %v791_v61 = vmul.f32 %v789_v59, %v783_v52  ;;  %v1641_v59 = vsub.s32 6, %v3434_v38 }
 0x46c   :  { %v2973_v53 = vpop.f32.mrf.mxu1  ;;  %v2987_v54 = vpop.f32.mrf.mxu0 }
 0x46d   :  { %v1563_v53 = vsub.s32 5, %v3434_v38  ;;  %v1485_v54 = vsub.s32 4, %v3434_v38 }
 0x46e   :  { %v701_v56 = vpop.f32.mrf.mxu1 }
 0x46f   :  { %v709_v58 = vmul.f32 %v707_v55, %v701_v56 }
 0x470   :  { %v2980_v60 = vpop.f32.mrf.mxu1 }
 0x471   :  { %v710_v62 = vadd.f32 %v709_v58, %v626_v57  ;;  %v3458_v57 = vld [vmem:[#allocation2 + $0x130] sm:$0xff]  ;;  %v1719_v58 = vsub.s32 7, %v3434_v38  ;;  %v3466_v60 = vld [vmem:[#allocation2 + $0x128] sm:$0xff] }
 0x473   :  { %v792_v63 = vadd.f32 %v791_v61, %v710_v62  ;;  %v3474_v62 = vld [vmem:[#allocation2 + $0x120] sm:$0xff] }
 0x475   :  { %2997 = vmatmul.mubr.msk.f32.vlgmr.msra.gmra.mxu1 %vm33_vm1, %v792_v63 }
 0x476   :  { %3018 = vmatprep.mubr.msk.f32.mxu1 %vm3255_vm0, %v3254_v0  ;;  %3011 = vmatpush3.msra.mxu1 %v991_v15 }
 0x477   :  { %3012 = vmatprep.subr.mxu1 %v3254_v0 }
 0x478   :  { %3013 = vmatpush3.msra.mxu1 %v990_v16 }
 0x479   :  { %3014 = vmatprep.subr.mxu1 %v3254_v0 }
 0x47a   :  { %3015 = vmatpush3.msra.mxu1 %v989_v17 }
 0x47b   :  { %3016 = vmatprep.subr.mxu1 %v3254_v0 }
 0x47c   :  { %3017 = vmatpush3.msra.mxu1 %v988_v18 }
 0x47d   :  { %3019 = vmatmul.mubr.msk.f32.vlgmr.msra.gmra.mxu1 %vm33_vm1, %v986_v19  ;;  %3032 = vmatprep.subr.mxu1 %v3254_v0 }
 0x47e   :  { %3040 = vmatprep.mubr.msk.f32.mxu1 %vm3255_vm0, %v3254_v0  ;;  %3033 = vmatpush3.msra.mxu1 %v3428_v34 }
 0x47f   :  { %3034 = vmatprep.subr.mxu1 %v3254_v0 }
 0x480   :  { %3035 = vmatpush3.msra.mxu1 %v3458_v57 }
 0x481   :  { %3036 = vmatprep.subr.mxu1 %v3254_v0 }
 0x482   :  { %3037 = vmatpush3.msra.mxu1 %v3466_v60 }
 0x483   :  { %3038 = vmatprep.subr.mxu1 %v3254_v0 }
 0x484   :  { %3039 = vmatpush3.msra.mxu1 %v3474_v62 }
 0x485   :  { %3054 = vmatprep.subr.mxu1 %v3254_v0 }
 0x535   :  { %v872_v2 = vpop.f32.mrf.mxu1 }
 0x536   :  { %v873_v3 = vadd.f32 %v2761_v1, %v872_v2  ;;  %v2768_v1 = vld [vmem:[%s3672_s2 + $0xb] ss:$0 sm:$0xff] }
 0x537   :  { %v2998_v4 = vpop.f32.mrf.mxu1 }
 0x538   :  { %v879_v5 = vsel %vm878_vm6, %v873_v3, 0.0 }
 0x539   :  { %880 = vadd.xlane.f32.xlu0 %v879_v5 }
 0x53d   :  { %v1061_v35 = vpop.f32.mrf.mxu1 }
 0x53e   :  { %v3489_v2 = vadd.f32 %v2768_v1, %v1061_v35 }
 0x53f   :  { %v3020_v36 = vpop.f32.mrf.mxu1 }
 0x540   :  { %v1408_v12 = vrot.slane %v3489_v2, %v1407_v43  ;;  %v1330_v13 = vrot.slane %v3489_v2, %v1329_v44  ;;  %v1564_v16 = vrot.slane %v3489_v2, %v1563_v53  ;;  %v1486_v17 = vrot.slane %v3489_v2, %v1485_v54 }
 0x54f   :  { %1077 = vrot.lane.b32.xlu0 %v2769_v33, %s3256_s1 }
 0x5c2   :  { %v881_v6 = vpop.xlane.xlu0 %880 }
 0x5c3   :  { %v883_v7 = vmul.f32 0.03125, %v881_v6  ;;  %v1252_v6 = vrot.slane %v3489_v2, %v1251_v39 }
 0x5c5   :  { %v884_v8 = vsub.f32 %v873_v3, %v883_v7  ;;  %v2770_v3 = vld [vmem:[%s3672_s2 + $0xa] ss:$0 sm:$0xff]  ;;  %v1174_v7 = vrot.slane %v3489_v2, %v1173_v40 }
 0x5c6   :  { %v1078_v41 = vpop.permute.xlu0 %1077 }
 0x5c7   :  { %v885_v9 = vmul.f32 %v884_v8, %v884_v8  ;;  %v1080_v42 = vadd.f32 %v1078_v41, %v1061_v35 }
 0x5c9   :  { %v886_v10 = vsel %vm878_vm6, %v885_v9, 0.0  ;;  %v1995_v45 = vrot.slane %v1080_v42, %v1251_v39  ;;  %v1912_v46 = vrot.slane %v1080_v42, %v1173_v40  ;;  %v2163_v47 = vrot.slane %v1080_v42, %v1407_v43 }
 0x5ca   :  { %887 = vadd.xlane.f32.xlu1 %v886_v10  ;;  %v2079_v48 = vrot.slane %v1080_v42, %v1329_v44  ;;  %v2331_v55 = vrot.slane %v1080_v42, %v1563_v53  ;;  %v2247_v56 = vrot.slane %v1080_v42, %v1485_v54  ;;  %v2499_v61 = vrot.slane %v1080_v42, %v1719_v58 }
 0x5cb   :  { %1997 = vrot.lane.b32.xlu0 %v1995_v45, %s3258_s27  ;;  %v2415_v63 = vrot.slane %v1080_v42, %v1641_v59 }
 0x5cf   :  { %2165 = vrot.lane.b32.xlu0 %v2163_v47, %s3258_s27 }
 0x5d3   :  { %2333 = vrot.lane.b32.xlu0 %v2331_v55, %s3258_s27 }
 0x5d7   :  { %2501 = vrot.lane.b32.xlu0 %v2499_v61, %s3258_s27 }
 0x5db   :  { %1914 = vrot.lane.b32.xlu1 %v1912_v46, %s3258_s27 }
 0x5df   :  { %2081 = vrot.lane.b32.xlu1 %v2079_v48, %s3258_s27 }
 0x5e3   :  { %2249 = vrot.lane.b32.xlu1 %v2247_v56, %s3258_s27 }
 0x5e7   :  { %2417 = vrot.lane.b32.xlu1 %v2415_v63, %s3258_s27 }
 0x653   :  { %v888_v20 = vpop.xlane.xlu1 %887 }
 0x654   :  { %v889_v21 = vmul.f32 0.03125, %v888_v20  ;;  %v1720_v20 = vrot.slane %v3489_v2, %v1719_v58 }
 0x656   :  { %v890_v22 = vadd.f32 1e-05, %v889_v21  ;;  %v1642_v21 = vrot.slane %v3489_v2, %v1641_v59 }
 0x658   :  { %3207 = vrsqrt.f32 %v890_v22 }
 0x665   :  { %v3208_v23 = vpop.eup %3207 }
 0x666   :  { %v892_v25 = vmul.f32 %v3208_v23, %v884_v8 }
 0x668   :  { %v897_v27 = vmul.f32 %v2763_v24, %v892_v25  ;;  %v3595_v24 = vld [vmem:[%s3672_s2 + $0x28] sm:$0xff] }
 0x66a   :  { %v902_v28 = vadd.f32 %v2764_v26, %v897_v27 }
 0x66c   :  { %3008 = vmatmul.mubr.msk.f32.vlgmr.msra.gmra.mxu0 %vm33_vm1, %v902_v28 }
 0x66d   :  { %3022 = vmatpush3.msra.mxu0 %v1085_v29  ;;  %3029 = vmatprep.mubr.msk.f32.mxu0 %vm3255_vm0, %v3254_v0 }
 0x66e   :  { %3023 = vmatprep.subr.mxu0 %v3254_v0 }
 0x66f   :  { %3024 = vmatpush3.msra.mxu0 %v1084_v30 }
 0x670   :  { %3025 = vmatprep.subr.mxu0 %v3254_v0 }
 0x671   :  { %3026 = vmatpush3.msra.mxu0 %v1083_v31 }
 0x672   :  { %3027 = vmatprep.subr.mxu0 %v3254_v0 }
 0x673   :  { %3028 = vmatpush3.msra.mxu0 %v1082_v32 }
 0x674   :  { %3043 = vmatprep.subr.mxu0 %v3254_v0 }
 0x72c   :  { %v982_v50 = vpop.f32.mrf.mxu0 }
 0x72d   :  { %v983_v51 = vadd.f32 %v2765_v49, %v982_v50 }
 0x72e   :  { %v3009_v52 = vpop.f32.mrf.mxu0 }
 0x72f   :  { %3030 = vmatmul.mubr.msk.f32.vlgmr.msra.gmra.mxu0 %vm33_vm1, %v983_v51 }
 0x730   :  { %3044 = vmatpush3.msra.mxu0 %v3428_v34  ;;  %3051 = vmatprep.mubr.msk.f32.mxu0 %vm3255_vm0, %v3254_v0 }
 0x731   :  { %3045 = vmatprep.subr.mxu0 %v3254_v0 }
 0x732   :  { %3046 = vmatpush3.msra.mxu0 %v3458_v57 }
 0x733   :  { %3047 = vmatprep.subr.mxu0 %v3254_v0 }
 0x734   :  { %3048 = vmatpush3.msra.mxu0 %v3466_v60 }
 0x735   :  { %3049 = vmatprep.subr.mxu0 %v3254_v0 }
 0x736   :  { %3050 = vmatpush3.msra.mxu0 %v3474_v62 }
 0x737   :  { %3065 = vmatprep.subr.mxu0 %v3254_v0 }
 0x7ef   :  { %v1160_v4 = vpop.f32.mrf.mxu0 }
 0x7f0   :  { %v1161_v5 = vadd.f32 %v2770_v3, %v1160_v4 }
 0x7f1   :  { %v3031_v8 = vpop.f32.mrf.mxu0 }
 0x7f2   :  { %v3496_v9 = vmul.f32 0.5, %v1161_v5 }
 0x7f4   :  { %v1175_v10 = vmul.f32 %v1174_v7, %v3496_v9  ;;  %v1253_v11 = vmul.f32 %v1252_v6, %v3496_v9  ;;  %v1331_v14 = vmul.f32 %v1330_v13, %v3496_v9  ;;  %v1409_v15 = vmul.f32 %v1408_v12, %v3496_v9 }
 0x7f5   :  { %v1565_v18 = vmul.f32 %v1564_v16, %v3496_v9  ;;  %v1487_v19 = vmul.f32 %v1486_v17, %v3496_v9  ;;  %v1721_v22 = vmul.f32 %v1720_v20, %v3496_v9  ;;  %v1643_v23 = vmul.f32 %v1642_v21, %v3496_v9 }
 0x7f6   :  { %3041 = vmatmul.mubr.msk.f32.vlgmr.msra.gmra.mxu1 %vm33_vm1, %v1175_v10  ;;  %3052 = vmatmul.mubr.msk.f32.vlgmr.msra.gmra.mxu0 %vm33_vm1, %v1253_v11 }
 0x7f7   :  { %3055 = vmatpush3.msra.mxu1 %v3428_v34  ;;  %3066 = vmatpush3.msra.mxu0 %v3428_v34 }
 0x7f8   :  { %3056 = vmatprep.subr.mxu1 %v3254_v0  ;;  %3067 = vmatprep.subr.mxu0 %v3254_v0 }
 0x7f9   :  { %3057 = vmatpush3.msra.mxu1 %v3458_v57  ;;  %3068 = vmatpush3.msra.mxu0 %v3458_v57 }
 0x7fa   :  { %3058 = vmatprep.subr.mxu1 %v3254_v0  ;;  %3069 = vmatprep.subr.mxu0 %v3254_v0 }
 0x7fb   :  { %3059 = vmatpush3.msra.mxu1 %v3466_v60  ;;  %3070 = vmatpush3.msra.mxu0 %v3466_v60 }
 0x7fc   :  { %3060 = vmatprep.subr.mxu1 %v3254_v0  ;;  %3071 = vmatprep.subr.mxu0 %v3254_v0 }
 0x7fd   :  { %3061 = vmatpush3.msra.mxu1 %v3474_v62  ;;  %3062 = vmatprep.mubr.msk.f32.mxu1 %vm3255_vm0, %v3254_v0 }
 0x7fe   :  { %3072 = vmatpush3.msra.mxu0 %v3474_v62  ;;  %3073 = vmatprep.mubr.msk.f32.mxu0 %vm3255_vm0, %v3254_v0 }
 0x7ff   :  { %3063 = vmatmul.mubr.msk.f32.vlgmr.msra.gmra.mxu1 %vm33_vm1, %v1331_v14  ;;  %3074 = vmatmul.mubr.msk.f32.vlgmr.msra.gmra.mxu0 %vm33_vm1, %v1409_v15 }
 0x800   :  { %3076 = vmatprep.subr.mxu1 %v3254_v0  ;;  %3087 = vmatprep.subr.mxu0 %v3254_v0 }
 0x801   :  { %3077 = vmatpush3.msra.mxu1 %v3428_v34  ;;  %3088 = vmatpush3.msra.mxu0 %v3428_v34 }
 0x802   :  { %3078 = vmatprep.subr.mxu1 %v3254_v0  ;;  %3089 = vmatprep.subr.mxu0 %v3254_v0 }
 0x803   :  { %3079 = vmatpush3.msra.mxu1 %v3458_v57  ;;  %3090 = vmatpush3.msra.mxu0 %v3458_v57 }
 0x804   :  { %3080 = vmatprep.subr.mxu1 %v3254_v0  ;;  %3091 = vmatprep.subr.mxu0 %v3254_v0 }
 0x805   :  { %3081 = vmatpush3.msra.mxu1 %v3466_v60  ;;  %3092 = vmatpush3.msra.mxu0 %v3466_v60 }
 0x806   :  { %3082 = vmatprep.subr.mxu1 %v3254_v0  ;;  %3093 = vmatprep.subr.mxu0 %v3254_v0 }
 0x807   :  { %3083 = vmatpush3.msra.mxu1 %v3474_v62  ;;  %3084 = vmatprep.mubr.msk.f32.mxu1 %vm3255_vm0, %v3254_v0 }
 0x808   :  { %3094 = vmatpush3.msra.mxu0 %v3474_v62  ;;  %3095 = vmatprep.mubr.msk.f32.mxu0 %vm3255_vm0, %v3254_v0 }
 0x809   :  { %3085 = vmatmul.mubr.msk.f32.vlgmr.msra.gmra.mxu1 %vm33_vm1, %v1487_v19  ;;  %3096 = vmatmul.mubr.msk.f32.vlgmr.msra.gmra.mxu0 %vm33_vm1, %v1565_v18 }
 0x80a   :  { %3098 = vmatprep.subr.mxu1 %v3254_v0  ;;  %3109 = vmatprep.subr.mxu0 %v3254_v0 }
 0x80b   :  { %3099 = vmatpush3.msra.mxu1 %v3428_v34  ;;  %3110 = vmatpush3.msra.mxu0 %v3428_v34 }
 0x80c   :  { %3100 = vmatprep.subr.mxu1 %v3254_v0  ;;  %3111 = vmatprep.subr.mxu0 %v3254_v0 }
 0x80d   :  { %3101 = vmatpush3.msra.mxu1 %v3458_v57  ;;  %3112 = vmatpush3.msra.mxu0 %v3458_v57 }
 0x80e   :  { %3102 = vmatprep.subr.mxu1 %v3254_v0  ;;  %3113 = vmatprep.subr.mxu0 %v3254_v0 }
 0x80f   :  { %3103 = vmatpush3.msra.mxu1 %v3466_v60  ;;  %3114 = vmatpush3.msra.mxu0 %v3466_v60 }
 0x810   :  { %3104 = vmatprep.subr.mxu1 %v3254_v0  ;;  %3115 = vmatprep.subr.mxu0 %v3254_v0 }
 0x811   :  { %3105 = vmatpush3.msra.mxu1 %v3474_v62  ;;  %3106 = vmatprep.mubr.msk.f32.mxu1 %vm3255_vm0, %v3254_v0 }
 0x812   :  { %3116 = vmatpush3.msra.mxu0 %v3474_v62  ;;  %3117 = vmatprep.mubr.msk.f32.mxu0 %vm3255_vm0, %v3254_v0 }
 0x813   :  { %3107 = vmatmul.mubr.msk.f32.vlgmr.msra.gmra.mxu1 %vm33_vm1, %v1643_v23  ;;  %3118 = vmatmul.mubr.msk.f32.vlgmr.msra.gmra.mxu0 %vm33_vm1, %v1721_v22 }
 0x814   :  { %3120 = vmatprep.subr.mxu1 %v3254_v0  ;;  %3125 = vmatprep.subr.mxu0 %v3254_v0 }
 0x815   :  { %3122 = vmatprep.mubr.msk.f32.mxu1 %vm3255_vm0, %v3254_v0  ;;  %3127 = vmatprep.mubr.msk.f32.mxu0 %vm3255_vm0, %v3254_v0 }
 0x816   :  { %3121 = vmatpush3.msra.mxu1 %v3595_v24  ;;  %3126 = vmatpush3.msra.mxu0 %v3595_v24 }
 0x817   :  { %3130 = vmatprep.subr.mxu1 %v3254_v0  ;;  %3135 = vmatprep.subr.mxu0 %v3254_v0 }
 0x8b6   :  { %v1245_v25 = vpop.f32.mrf.mxu1  ;;  %v1323_v26 = vpop.f32.mrf.mxu0 }
 0x8b7   :  { %v1795_v33 = vmax.f32 %v1245_v25, %v1323_v26 }
 0x8b8   :  { %v3042_v27 = vpop.f32.mrf.mxu1  ;;  %v3053_v28 = vpop.f32.mrf.mxu0 }
 0x8b9   :  { %v2509_v27 = vld [vmem:[#allocation2 + $0xd0] sm:$0xff]  ;;  %v2508_v28 = vld [vmem:[#allocation2 + $0xc8] sm:$0xff] }
 0x8bf   :  { %v1401_v29 = vpop.f32.mrf.mxu1  ;;  %v1479_v30 = vpop.f32.mrf.mxu0 }
 0x8c0   :  { %v1796_v34 = vmax.f32 %v1795_v33, %v1401_v29  ;;  %v1998_v33 = vpop.permute.xlu0 %1997 }
 0x8c1   :  { %v3064_v31 = vpop.f32.mrf.mxu1  ;;  %v3075_v32 = vpop.f32.mrf.mxu0 }
 0x8c2   :  { %v1797_v40 = vmax.f32 %v1796_v34, %v1479_v30  ;;  %v2507_v31 = vld [vmem:[#allocation2 + $0xc0] sm:$0xff]  ;;  %v1915_v32 = vpop.permute.xlu1 %1914 }
 0x8c6   :  { %v2082_v34 = vpop.permute.xlu1 %2081 }
 0x8c9   :  { %v1557_v35 = vpop.f32.mrf.mxu1  ;;  %v1635_v36 = vpop.f32.mrf.mxu0 }
 0x8ca   :  { %v1798_v41 = vmax.f32 %v1797_v40, %v1557_v35 }
 0x8cb   :  { %v3086_v37 = vpop.f32.mrf.mxu1  ;;  %v3097_v39 = vpop.f32.mrf.mxu0 }
 0x8cc   :  { %v1799_v42 = vmax.f32 %v1798_v41, %v1635_v36  ;;  %v2166_v37 = vpop.permute.xlu0 %2165 }
 0x8d3   :  { %v1713_v43 = vpop.f32.mrf.mxu1  ;;  %v1791_v44 = vpop.f32.mrf.mxu0 }
 0x8d4   :  { %v1800_v45 = vmax.f32 %v1799_v42, %v1713_v43 }
 0x8d5   :  { %v3108_v46 = vpop.f32.mrf.mxu1  ;;  %v3119_v47 = vpop.f32.mrf.mxu0 }
 0x8d6   :  { %v1801_v48 = vmax.f32 %v1800_v45, %v1791_v44  ;;  %v2250_v45 = vpop.permute.xlu1 %2249 }
 0x8d8   :  { %v1802_v49 = vsub.f32 %v1245_v25, %v1801_v48  ;;  %v1805_v50 = vsub.f32 %v1323_v26, %v1801_v48  ;;  %v1808_v51 = vsub.f32 %v1401_v29, %v1801_v48  ;;  %v1811_v52 = vsub.f32 %v1479_v30, %v1801_v48  ;;  %v2593_v29 = vld [vmem:[#allocation2 + $0xf8] sm:$0xff]  ;;  %v2592_v30 = vld [vmem:[#allocation2 + $0xf0] sm:$0xff] }
 0x8d9   :  { %v1814_v56 = vsub.f32 %v1557_v35, %v1801_v48  ;;  %v1817_v58 = vsub.f32 %v1635_v36, %v1801_v48  ;;  %v1820_v60 = vsub.f32 %v1713_v43, %v1801_v48  ;;  %v1823_v62 = vsub.f32 %v1791_v44, %v1801_v48 }
 0x8da   :  { %v1803_v53 = vmul.f32 1.442695, %v1802_v49  ;;  %v1806_v54 = vmul.f32 1.442695, %v1805_v50  ;;  %v1809_v55 = vmul.f32 1.442695, %v1808_v51  ;;  %v2334_v50 = vpop.permute.xlu0 %2333 }
 0x8db   :  { %v1812_v57 = vmul.f32 1.442695, %v1811_v52  ;;  %v1815_v59 = vmul.f32 1.442695, %v1814_v56  ;;  %v1818_v61 = vmul.f32 1.442695, %v1817_v58 }
 0x8dc   :  { %3209 = vpow2.f32 %v1803_v53  ;;  %v1821_v63 = vmul.f32 1.442695, %v1820_v60  ;;  %v1824_v1 = vmul.f32 1.442695, %v1823_v62 }
 0x8dd   :  { %3211 = vpow2.f32 %v1806_v54 }
 0x8de   :  { %3213 = vpow2.f32 %v1809_v55 }
 0x8df   :  { %3215 = vpow2.f32 %v1812_v57 }
 0x8e0   :  { %3217 = vpow2.f32 %v1815_v59  ;;  %v2418_v59 = vpop.permute.xlu1 %2417 }
 0x8e1   :  { %3219 = vpow2.f32 %v1818_v61 }
 0x8e2   :  { %3221 = vpow2.f32 %v1821_v63 }
 0x8e3   :  { %3223 = vpow2.f32 %v1824_v1  ;;  %v2502_v1 = vpop.permute.xlu0 %2501 }
 0x8e9   :  { %v3210_v2 = vpop.eup %3209 }
 0x8ea   :  { %v3212_v3 = vpop.eup %3211 }
 0x8eb   :  { %v1826_v4 = vadd.f32 %v3212_v3, %v3210_v2  ;;  %v3214_v5 = vpop.eup %3213 }
 0x8ec   :  { %v3216_v7 = vpop.eup %3215 }
 0x8ed   :  { %v1827_v6 = vadd.f32 %v3214_v5, %v1826_v4  ;;  %v3218_v9 = vpop.eup %3217 }
 0x8ee   :  { %v3220_v11 = vpop.eup %3219 }
 0x8ef   :  { %v1828_v8 = vadd.f32 %v3216_v7, %v1827_v6  ;;  %v3222_v13 = vpop.eup %3221 }
 0x8f0   :  { %v3224_v15 = vpop.eup %3223 }
 0x8f1   :  { %v1829_v10 = vadd.f32 %v3218_v9, %v1828_v8 }
 0x8f3   :  { %v1830_v12 = vadd.f32 %v3220_v11, %v1829_v10  ;;  %v2590_v10 = vld [vmem:[#allocation2 + $0xe0] sm:$0xff] }
 0x8f5   :  { %v1831_v14 = vadd.f32 %v3222_v13, %v1830_v12 }
 0x8f7   :  { %v1832_v16 = vadd.f32 %v3224_v15, %v1831_v14 }
 0x8f9   :  { %3225 = vrcp.f32 %v1832_v16 }
 0x906   :  { %v3226_v17 = vpop.eup %3225 }
 0x907   :  { %v1834_v18 = vmul.f32 %v3226_v17, %v3210_v2  ;;  %v1918_v19 = vmul.f32 %v3226_v17, %v3212_v3  ;;  %v2002_v20 = vmul.f32 %v3226_v17, %v3214_v5  ;;  %v2086_v21 = vmul.f32 %v3226_v17, %v3216_v7 }
 0x908   :  { %v2170_v22 = vmul.f32 %v3226_v17, %v3218_v9  ;;  %v2254_v23 = vmul.f32 %v3226_v17, %v3220_v11  ;;  %v2338_v25 = vmul.f32 %v3226_v17, %v3222_v13  ;;  %v2422_v26 = vmul.f32 %v3226_v17, %v3224_v15  ;;  %v2591_v9 = vld [vmem:[#allocation2 + $0xe8] sm:$0xff] }
 0x909   :  { %3123 = vmatmul.mubr.msk.f32.vlgmr.msra.gmra.mxu1 %vm1835_vm7, %v1834_v18  ;;  %3128 = vmatmul.mubr.msk.f32.vlgmr.msra.gmra.mxu0 %vm1835_vm7, %v1918_v19  ;;  %v2788_v11 = vld [vmem:[%s3672_s2 + $0xd] ss:$0 sm:$0xff]  ;;  %v2790_v15 = vld [vmem:[%s3672_s2 + $0xe] ss:$0 sm:$0xff] }
 0x90a   :  { %3131 = vmatpush3.msra.mxu1 %v3595_v24  ;;  %3136 = vmatpush3.msra.mxu0 %v3595_v24 }
 0x90b   :  { %3132 = vmatprep.mubr.msk.f32.mxu1 %vm3255_vm0, %v3254_v0  ;;  %3137 = vmatprep.mubr.msk.f32.mxu0 %vm3255_vm0, %v3254_v0 }
 0x90c   :  { %3140 = vmatprep.subr.mxu1 %v3254_v0  ;;  %3145 = vmatprep.subr.mxu0 %v3254_v0 }
 0x90d   :  { %3133 = vmatmul.mubr.msk.f32.vlgmr.msra.gmra.mxu1 %vm1835_vm7, %v2002_v20  ;;  %3138 = vmatmul.mubr.msk.f32.vlgmr.msra.gmra.mxu0 %vm1835_vm7, %v2086_v21 }
 0x90e   :  { %3141 = vmatpush3.msra.mxu1 %v3595_v24  ;;  %3146 = vmatpush3.msra.mxu0 %v3595_v24 }
 0x90f   :  { %3142 = vmatprep.mubr.msk.f32.mxu1 %vm3255_vm0, %v3254_v0  ;;  %3147 = vmatprep.mubr.msk.f32.mxu0 %vm3255_vm0, %v3254_v0 }
 0x910   :  { %3150 = vmatprep.subr.mxu1 %v3254_v0  ;;  %3155 = vmatprep.subr.mxu0 %v3254_v0 }
 0x911   :  { %3143 = vmatmul.mubr.msk.f32.vlgmr.msra.gmra.mxu1 %vm1835_vm7, %v2170_v22  ;;  %3148 = vmatmul.mubr.msk.f32.vlgmr.msra.gmra.mxu0 %vm1835_vm7, %v2254_v23  ;;  %v3259_v23 = vmov 1966171168  }
 0x912   :  { %3151 = vmatpush3.msra.mxu1 %v3595_v24  ;;  %3156 = vmatpush3.msra.mxu0 %v3595_v24  ;;  %v2510_v24 = vld [vmem:[#allocation2 + $0xd8] sm:$0xff] }
 0x913   :  { %3152 = vmatprep.mubr.msk.f32.mxu1 %vm3255_vm0, %v3254_v0  ;;  %3157 = vmatprep.mubr.msk.f32.mxu0 %vm3255_vm0, %v3254_v0 }
 0x914   :  { %3160 = vmatprep.subr.mxu1 %v3254_v0  ;;  %3171 = vmatprep.subr.mxu0 %v3254_v0 }
 0x915   :  { %3153 = vmatmul.mubr.msk.f32.vlgmr.msra.gmra.mxu1 %vm1835_vm7, %v2338_v25  ;;  %3158 = vmatmul.mubr.msk.f32.vlgmr.msra.gmra.mxu0 %vm1835_vm7, %v2422_v26  ;;  %v2683_v25 = vunpack.c.l.s4 %v3259_v23 }
 0x916   :  { %3168 = vmatprep.mubr.msk.f32.mxu1 %vm3255_vm0, %v3254_v0  ;;  %3179 = vmatprep.mubr.msk.f32.mxu0 %vm3255_vm0, %v3254_v0 }
 0x917   :  { %3161 = vmatpush3.msra.mxu1 %v2510_v24  ;;  %3172 = vmatpush3.msra.mxu0 %v2593_v29  ;;  %v2684_v26 = vunpack.c.0.s8 %v2683_v25 }
 0x918   :  { %3162 = vmatprep.subr.mxu1 %v3254_v0  ;;  %3173 = vmatprep.subr.mxu0 %v3254_v0 }
 0x919   :  { %3163 = vmatpush3.msra.mxu1 %v2509_v27  ;;  %3174 = vmatpush3.msra.mxu0 %v2592_v30  ;;  %v2687_v29 = vsub.s32 %v2684_v26, %v3434_v38 }
 0x91a   :  { %3164 = vmatprep.subr.mxu1 %v3254_v0  ;;  %3175 = vmatprep.subr.mxu0 %v3254_v0 }
 0x91b   :  { %3165 = vmatpush3.msra.mxu1 %v2508_v28  ;;  %3176 = vmatpush3.msra.mxu0 %v2591_v9 }
 0x91c   :  { %3166 = vmatprep.subr.mxu1 %v3254_v0  ;;  %3177 = vmatprep.subr.mxu0 %v3254_v0 }
 0x91d   :  { %3167 = vmatpush3.msra.mxu1 %v2507_v31  ;;  %3178 = vmatpush3.msra.mxu0 %v2590_v10 }
 0x9c9   :  { %v1905_v35 = vpop.f32.mrf.mxu1  ;;  %v1988_v36 = vpop.f32.mrf.mxu0 }
 0x9ca   :  { %v1917_v39 = vmul.f32 %v1915_v32, %v1905_v35  ;;  %v2000_v40 = vmul.f32 %v1998_v33, %v1988_v36 }
 0x9cb   :  { %v3124_v41 = vpop.f32.mrf.mxu1  ;;  %v3129_v42 = vpop.f32.mrf.mxu0 }
 0x9cc   :  { %v2001_v46 = vadd.f32 %v2000_v40, %v1917_v39 }
 0x9cd   :  { %v2072_v43 = vpop.f32.mrf.mxu1  ;;  %v2156_v44 = vpop.f32.mrf.mxu0 }
 0x9ce   :  { %v2084_v47 = vmul.f32 %v2082_v34, %v2072_v43  ;;  %v2168_v52 = vmul.f32 %v2166_v37, %v2156_v44 }
 0x9cf   :  { %v3134_v48 = vpop.f32.mrf.mxu1  ;;  %v3139_v49 = vpop.f32.mrf.mxu0 }
 0x9d0   :  { %v2085_v51 = vadd.f32 %v2084_v47, %v2001_v46 }
 0x9d1   :  { %v2240_v53 = vpop.f32.mrf.mxu1  ;;  %v2324_v54 = vpop.f32.mrf.mxu0 }
 0x9d2   :  { %v2169_v55 = vadd.f32 %v2168_v52, %v2085_v51  ;;  %v2252_v56 = vmul.f32 %v2250_v45, %v2240_v53  ;;  %v2336_v61 = vmul.f32 %v2334_v50, %v2324_v54 }
 0x9d3   :  { %v3144_v57 = vpop.f32.mrf.mxu1  ;;  %v3149_v58 = vpop.f32.mrf.mxu0 }
 0x9d4   :  { %v2253_v60 = vadd.f32 %v2252_v56, %v2169_v55 }
 0x9d5   :  { %v2408_v62 = vpop.f32.mrf.mxu1  ;;  %v2492_v63 = vpop.f32.mrf.mxu0 }
 0x9d6   :  { %v2337_v2 = vadd.f32 %v2336_v61, %v2253_v60  ;;  %v2420_v3 = vmul.f32 %v2418_v59, %v2408_v62  ;;  %v2504_v7 = vmul.f32 %v2502_v1, %v2492_v63 }
 0x9d7   :  { %v3154_v4 = vpop.f32.mrf.mxu1  ;;  %v3159_v5 = vpop.f32.mrf.mxu0 }
 0x9d8   :  { %v2421_v6 = vadd.f32 %v2420_v3, %v2337_v2 }
 0x9da   :  { %v2505_v8 = vadd.f32 %v2504_v7, %v2421_v6 }
 0x9dc   :  { %3169 = vmatmul.mubr.msk.f32.vlgmr.msra.gmra.mxu1 %vm33_vm1, %v2505_v8 }
 0xa9c   :  { %v2585_v12 = vpop.f32.mrf.mxu1 }
 0xa9d   :  { %v2586_v13 = vadd.f32 %v2788_v11, %v2585_v12 }
 0xa9e   :  { %v3170_v14 = vpop.f32.mrf.mxu1 }
 0xa9f   :  { %3180 = vmatmul.mubr.msk.f32.vlgmr.msra.gmra.mxu0 %vm33_vm1, %v2586_v13 }
 0xb5f   :  { %v2668_v16 = vpop.f32.mrf.mxu0 }
 0xb60   :  { %v2669_v17 = vadd.f32 %v2790_v15, %v2668_v16 }
 0xb61   :  { %v3181_v18 = vpop.f32.mrf.mxu0 }
 0xb62   :  { %v2673_v19 = vmul.f32 0.044715, %v2669_v17  ;;  %v2672_v27 = vmul.f32 0.5, %v2669_v17 }
 0xb64   :  { %v2674_v20 = vmul.f32 %v2673_v19, %v2669_v17 }
 0xb66   :  { %v2675_v0 = vmul.f32 %v2674_v20, %v2669_v17 }
 0xb68   :  { %v2676_v21 = vadd.f32 %v2675_v0, %v2669_v17 }
 0xb6a   :  { %v2677_v22 = vmul.f32 0.7978846, %v2676_v21 }
 0xb6c   :  { %3227 = vtanh.f32 %v2677_v22 }
 0xb79   :  { %v3228_v24 = vpop.eup %3227 }
 0xb7a   :  { %v2679_v28 = vadd.f32 1.0, %v3228_v24 }
 0xb7c   :  { %v2680_v30 = vmul.f32 %v2679_v28, %v2672_v27 }
 0xb7e   :  { %v2688_v31 = vrot.slane %v2680_v30, %v2687_v29  ;;  %v2715_v32 = vcombine.high %v2680_v30, %v2680_v30 }
 0xb80   :  { %v2689_v33 = vcombine.high %v2688_v31, %v2688_v31  ;;  %v2696_v34 = vrot.slane %v2688_v31, %v2687_v29  ;;  %v2722_v35 = vrot.slane %v2715_v32, %v2687_v29 }
 0xb82   :  { %v2703_v36 = vrot.slane %v2689_v33, %v2687_v29  ;;  %2707 = vst.msk [vmem:[%s3673_s3] sm:$0x1] %vm2706_vm8, %v2696_v34  ;;  %v2709_v37 = vcombine.high %v2696_v34, %v2696_v34  ;;  %v2723_v39 = vcombine.high %v2722_v35, %v2722_v35  ;;  %v2730_v40 = vrot.slane %v2722_v35, %v2687_v29 }
 0xb84   :  { %2708 = vst.msk [vmem:[%s3673_s3 + $0x4] sm:$0x1] %vm2706_vm8, %v2703_v36  ;;  %v2710_v38 = vcombine.high %v2703_v36, %v2703_v36  ;;  %2713 = vst.msk [vmem:[%s3673_s3 + $0x1] sm:$0x1] %vm2706_vm8, %v2709_v37  ;;  %v2737_v41 = vrot.slane %v2723_v39, %v2687_v29 }
 0xb85   :  { %2740 = vst.msk [vmem:[%s3673_s3 + $0x2] sm:$0x1] %vm2706_vm8, %v2730_v40 }
 0xb86   :  { %2714 = vst.msk [vmem:[%s3673_s3 + $0x5] sm:$0x1] %vm2706_vm8, %v2710_v38  ;;  %2741 = vst.msk [vmem:[%s3673_s3 + $0x6] sm:$0x1] %vm2706_vm8, %v2737_v41 }
 0xb87   :  { %2746 = vsyncpa [#allocation3], 1 }

</bundles_post_ra>
